<compile_context>
chip_gen: v5e
topology: v5e:2x2
jax: 0.10.0
libtpu: 0.0.40
codegen_flags: <defaults>
</compile_context>

<pallas_src>
import functools

import jax
import jax.numpy as jnp
from jax.experimental import pallas as pl
from jax.experimental.pallas import tpu as pltpu

KSIZE = 7
PAD = 3
BN_EPS = 1e-5
_HIGHEST = jax.lax.Precision.HIGHEST


def _vmem_capacity_bytes():
    """Physical VMEM of the attached TPU (64 MiB fallback ~= v7x, the smallest)."""
    try:
        return int(pltpu.get_tpu_info().vmem_capacity_bytes)
    except Exception:
        return 64 * 1024 * 1024


def _pick_c_block(c, hw, itemsize, block_bytes_target):
    """Largest sublane-legal C block (divisor of c; multiple of 8 or == c)
    whose (c_blk, hw) tile stays within a per-block VMEM byte target."""
    max_c = max(1, block_bytes_target // max(1, hw * itemsize))
    if c <= max_c:
        return c
    for cand in range(min(c - 1, max_c), 7, -1):
        if c % cand == 0 and cand % 8 == 0:
            return cand
    # No budget-respecting divisor that is a multiple of 8; fall back to the
    # largest legal divisor (may exceed the soft target but stays correct).
    for cand in range(c - 1, 7, -1):
        if c % cand == 0 and cand % 8 == 0:
            return cand
    return c


def _flat_conv_operator(conv_weight, h, w, c):
    """Fold the whole padded 7x7 conv (and the 1/C of the mean pool) into one
    flat (2*H*W, H*W) matrix so the conv becomes a single MXU dot.

    Row m = i_src*W + j_src (+ H*W offset for the mean channel), col n = i*W + j,
    entry = weight[ch, i_src - i + PAD, j_src - j + PAD] where valid, else 0
    (the zeros encode the spatial zero padding exactly)."""
    hw = h * w
    wt = conv_weight.reshape(2, KSIZE, KSIZE).astype(jnp.float32)
    di = (jnp.arange(h)[:, None, None, None]
          - jnp.arange(h)[None, None, :, None] + PAD)          # (H, 1, H, 1)
    dj = (jnp.arange(w)[None, :, None, None]
          - jnp.arange(w)[None, None, None, :] + PAD)          # (1, W, 1, W)
    valid = (di >= 0) & (di < KSIZE) & (dj >= 0) & (dj < KSIZE)
    a = jnp.clip(di, 0, KSIZE - 1)
    k = jnp.clip(dj, 0, KSIZE - 1)
    m_max = jnp.where(valid, wt[0][a, k], 0.0).reshape(hw, hw)
    m_mean = jnp.where(valid, wt[1][a, k], 0.0).reshape(hw, hw) * (1.0 / c)
    return jnp.concatenate([m_max, m_mean], axis=0)             # (2*HW, HW)


def _pool_conv_kernel(x_ref, m_ref, y_ref, acc_ref, *, hw):
    """Grid (B, C-chunks).  Lane-dense channel max/sum pooling with a running
    accumulator across C chunks; on the last chunk one MXU dot does the whole
    padded 7x7 conv.

    x_ref  : (1, Cc, HW)   input block (lane-dense view of x)
    m_ref  : (2*HW, HW)    flat conv operator (grid-invariant, stays resident)
    y_ref  : (1, 1, HW)    conv output (pre-BN), lane-dense
    acc_ref: (1, 2*HW)     VMEM scratch: [running max | running sum]
    """
    c = pl.program_id(1)
    x = x_ref[0].astype(jnp.float32)                           # (Cc, HW)
    cmax = jnp.max(x, axis=0, keepdims=True)                   # (1, HW)
    csum = jnp.sum(x, axis=0, keepdims=True)                   # (1, HW)

    @pl.when(c == 0)
    def _():
        acc_ref[:, :hw] = cmax
        acc_ref[:, hw:] = csum

    @pl.when(c > 0)
    def _():
        acc_ref[:, :hw] = jnp.maximum(acc_ref[:, :hw], cmax)
        acc_ref[:, hw:] = acc_ref[:, hw:] + csum

    @pl.when(c == pl.num_programs(1) - 1)
    def _():
        # (1, 2*HW) @ (2*HW, HW): all 49 taps x {max, mean} fused in one dot.
        # HIGHEST is kept deliberately: this dot is negligible next to the two
        # HBM passes over x, and it preserves 1e-4 parity with the f32 ref.
        y_ref[0] = jnp.dot(acc_ref[...], m_ref[...],
                           precision=_HIGHEST,
                           preferred_element_type=jnp.float32)


def _apply_scale_kernel(x_ref, s_ref, o_ref):
    """Grid (B, C-blocks).  Pure HBM-bound stream: out = x * scale.

    x_ref: (1, Cb, HW), s_ref: (1, 1, HW), o_ref: (1, Cb, HW)."""
    o_ref[...] = (x_ref[...] * s_ref[...]).astype(o_ref.dtype)


def spatial_attention(x, conv_weight):
    """x: (B, C, H, W); conv_weight: (1, 2, 7, 7) -> (B, C, H, W)."""
    B, C, H, W = x.shape
    HW = H * W
    itemsize = jnp.dtype(x.dtype).itemsize

    cap = _vmem_capacity_bytes()
    blk_target = max(512 * 1024, cap // 16)   # ~8 MiB on 128 MiB parts, ~4 MiB on v7x

    conv_op = _flat_conv_operator(conv_weight, H, W, C)        # (2*HW, HW) f32
    x3 = x.reshape(B, C, HW)                                   # lane-dense view

    # ---- Kernel 1: channel pool (+ fused 7x7 conv on the last C chunk) ------
    cc = _pick_c_block(C, HW, itemsize, blk_target)
    n_cc = C // cc
    conv_op_bytes = 2 * HW * HW * 4
    k1_need = (2 * cc * HW * itemsize + 2 * conv_op_bytes
               + 4 * HW * 4 + 8 * 2 * HW * 4 + (4 << 20))
    k1_vmem = min(cap * 3 // 4, max(32 << 20, k1_need))

    y = pl.pallas_call(
        functools.partial(_pool_conv_kernel, hw=HW),
        out_shape=jax.ShapeDtypeStruct((B, 1, HW), jnp.float32),
        grid=(B, n_cc),
        in_specs=[
            pl.BlockSpec((1, cc, HW), lambda b, c: (b, c, 0)),
            pl.BlockSpec((2 * HW, HW), lambda b, c: (0, 0)),
        ],
        out_specs=pl.BlockSpec((1, 1, HW), lambda b, c: (b, 0, 0)),
        scratch_shapes=[pltpu.VMEM((1, 2 * HW), jnp.float32)],
        compiler_params=pltpu.CompilerParams(
            dimension_semantics=("parallel", "arbitrary"),
            vmem_limit_bytes=int(k1_vmem)),
        cost_estimate=pl.CostEstimate(
            flops=B * (2 * C * HW + 2 * (2 * HW) * HW),
            transcendentals=0,
            bytes_accessed=itemsize * B * C * HW + conv_op_bytes + 4 * B * HW),
    )(x3, conv_op)

    # ---- BatchNorm2d(1) (training mode, batch stats) + relu + sigmoid -------
    # The stats are global over (B, 1, H, W), so they live between the two
    # kernels; the per-pixel scale is hoisted here (tiny, fused by XLA with
    # the stats reduction) so kernel 2 never recomputes the sigmoid per block.
    mu = jnp.mean(y)
    var = jnp.mean(jnp.square(y - mu))                         # two-pass (stable)
    inv_std = jax.lax.rsqrt(var + BN_EPS)
    scale = jax.nn.sigmoid(jnp.maximum((y - mu) * inv_std, 0.0))   # (B, 1, HW)
    # NOTE: BN running-stat updates (momentum=0.01) are a training side effect
    # that does not change the forward output; not implemented here.

    # ---- Kernel 2: lane-dense x * scale stream -------------------------------
    cb = _pick_c_block(C, HW, itemsize, blk_target)
    n_cb = C // cb
    k2_need = 2 * 2 * cb * HW * itemsize + 2 * HW * 4 + (4 << 20)
    k2_vmem = min(cap * 3 // 4, max(32 << 20, k2_need))

    out = pl.pallas_call(
        _apply_scale_kernel,
        out_shape=jax.ShapeDtypeStruct((B, C, HW), x.dtype),
        grid=(B, n_cb),
        in_specs=[
            pl.BlockSpec((1, cb, HW), lambda b, c: (b, c, 0)),
            pl.BlockSpec((1, 1, HW), lambda b, c: (b, 0, 0)),
        ],
        out_specs=pl.BlockSpec((1, cb, HW), lambda b, c: (b, c, 0)),
        compiler_params=pltpu.CompilerParams(
            dimension_semantics=("parallel", "parallel"),
            vmem_limit_bytes=int(k2_vmem)),
        cost_estimate=pl.CostEstimate(
            flops=B * C * HW,
            transcendentals=0,
            bytes_accessed=2 * itemsize * B * C * HW + 4 * B * HW),
        # input_output_aliases={0: 0},  # enable if the caller donates x
    )(x3, scale)
    return out.reshape(B, C, H, W)


def reference_forward(x, conv_weight):
    pooled = jnp.concatenate(
        [jnp.max(x, axis=1, keepdims=True), jnp.mean(x, axis=1, keepdims=True)],
        axis=1)
    conv = jax.lax.conv_general_dilated(
        pooled, conv_weight, window_strides=(1, 1),
        padding=((PAD, PAD), (PAD, PAD)),
        dimension_numbers=("NCHW", "OIHW", "NCHW"),
        precision=jax.lax.Precision.HIGHEST)
    mu = jnp.mean(conv)
    var = jnp.mean((conv - mu) ** 2)
    yn = (conv - mu) * jax.lax.rsqrt(var + BN_EPS)
    return x * jax.nn.sigmoid(jnp.maximum(yn, 0.0))


if __name__ == "__main__":
    key = jax.random.PRNGKey(0)
    kx, kw = jax.random.split(key)

    B, C, H, W = 2, 4, 16, 16
    x = jax.random.normal(kx, (B, C, H, W), dtype=jnp.float32)

    # Deterministic Kaiming-uniform-like conv init, fan_in = 2*7*7.
    fan_in = 2 * KSIZE * KSIZE
    bound = (6.0 / fan_in) ** 0.5
    conv_weight = jax.random.uniform(
        kw, (1, 2, KSIZE, KSIZE), minval=-bound, maxval=bound, dtype=jnp.float32)

    out = jax.block_until_ready(jax.jit(spatial_attention)(x, conv_weight))
    ref = jax.block_until_ready(reference_forward(x, conv_weight))

    assert out.shape == ref.shape
    err = float(jnp.max(jnp.abs(out - ref)))
    assert err < 1e-4, f"max abs error = {err}"
    print("KERNEL_OK")
</pallas_src>

<mosaic_0001>
module attributes {stable_mosaic.version = 11 : i64} {
  func.func @_pool_conv_kernel(%arg0: i32, %arg1: i32, %arg2: memref<1x4x256xf32, #tpu.memory_space<vmem>>, %arg3: memref<512x256xf32, #tpu.memory_space<vmem>>, %arg4: memref<1x1x256xf32, #tpu.memory_space<vmem>>, %arg5: memref<1x512xf32, #tpu.memory_space<vmem>>) attributes {dimension_semantics = [#tpu.dimension_semantics<parallel>, #tpu.dimension_semantics<arbitrary>], iteration_bounds = array<i64: 2, 1>, scalar_prefetch = 0 : i64, scratch_operands = 1 : i64, tpu.core_type = #tpu.core_type<tc>, window_params = [{transform_indices = @transform_0, window_bounds = array<i64: 1, 4, 256>}, {pipeline_mode = #tpu.pipeline_mode<synchronous>, transform_indices = @transform_1, window_bounds = array<i64: 512, 256>}, {transform_indices = @transform_2, window_bounds = array<i64: 1, 1, 256>}]} {
    %c0 = arith.constant 0 : index
    %c0_0 = arith.constant 0 : index
    %c0_1 = arith.constant 0 : index
    %0 = vector.load %arg2[%c0, %c0_0, %c0_1] : memref<1x4x256xf32, #tpu.memory_space<vmem>>, vector<1x4x256xf32>
    %1 = vector.shape_cast %0 : vector<1x4x256xf32> to vector<4x256xf32>
    %cst = arith.constant dense<0xFF800000> : vector<256xf32>
    %2 = vector.multi_reduction <maximumf>, %1, %cst [0] : vector<4x256xf32> to vector<256xf32>
    %3 = vector.shape_cast %2 : vector<256xf32> to vector<1x256xf32>
    %cst_2 = arith.constant dense<0.000000e+00> : vector<256xf32>
    %4 = vector.multi_reduction <add>, %1, %cst_2 [0] : vector<4x256xf32> to vector<256xf32>
    %5 = vector.shape_cast %4 : vector<256xf32> to vector<1x256xf32>
    %c0_i32 = arith.constant 0 : i32
    %6 = arith.cmpi eq, %arg1, %c0_i32 : i32
    %7 = arith.extui %6 : i1 to i32
    %c0_i32_3 = arith.constant 0 : i32
    %8 = arith.cmpi ne, %7, %c0_i32_3 : i32
    scf.if %8 {
      %c0_8 = arith.constant 0 : index
      %c0_9 = arith.constant 0 : index
      %15 = vector.load %arg5[%c0_8, %c0_9] : memref<1x512xf32, #tpu.memory_space<vmem>>, vector<1x256xf32>
      tpu.vector_store %arg5[%c0_8, %c0_9], %3 {strides = array<i32>} : memref<1x512xf32, #tpu.memory_space<vmem>>, vector<1x256xf32>,
      %c0_10 = arith.constant 0 : index
      %c256 = arith.constant 256 : index
      %16 = vector.load %arg5[%c0_10, %c256] : memref<1x512xf32, #tpu.memory_space<vmem>>, vector<1x256xf32>
      tpu.vector_store %arg5[%c0_10, %c256], %5 {strides = array<i32>} : memref<1x512xf32, #tpu.memory_space<vmem>>, vector<1x256xf32>,
    } else {
    }
    %c0_i32_4 = arith.constant 0 : i32
    %9 = arith.cmpi sgt, %arg1, %c0_i32_4 : i32
    %10 = arith.extui %9 : i1 to i32
    %c0_i32_5 = arith.constant 0 : i32
    %11 = arith.cmpi ne, %10, %c0_i32_5 : i32
    scf.if %11 {
      %c0_8 = arith.constant 0 : index
      %c0_9 = arith.constant 0 : index
      %15 = vector.load %arg5[%c0_8, %c0_9] : memref<1x512xf32, #tpu.memory_space<vmem>>, vector<1x256xf32>
      %16 = arith.maximumf %15, %3 : vector<1x256xf32>
      %c0_10 = arith.constant 0 : index
      %c0_11 = arith.constant 0 : index
      %17 = vector.load %arg5[%c0_10, %c0_11] : memref<1x512xf32, #tpu.memory_space<vmem>>, vector<1x256xf32>
      tpu.vector_store %arg5[%c0_10, %c0_11], %16 {strides = array<i32>} : memref<1x512xf32, #tpu.memory_space<vmem>>, vector<1x256xf32>,
      %c0_12 = arith.constant 0 : index
      %c256 = arith.constant 256 : index
      %18 = vector.load %arg5[%c0_12, %c256] : memref<1x512xf32, #tpu.memory_space<vmem>>, vector<1x256xf32>
      %19 = arith.addf %18, %5 : vector<1x256xf32>
      %c0_13 = arith.constant 0 : index
      %c256_14 = arith.constant 256 : index
      %20 = vector.load %arg5[%c0_13, %c256_14] : memref<1x512xf32, #tpu.memory_space<vmem>>, vector<1x256xf32>
      tpu.vector_store %arg5[%c0_13, %c256_14], %19 {strides = array<i32>} : memref<1x512xf32, #tpu.memory_space<vmem>>, vector<1x256xf32>,
    } else {
    }
    %c0_i32_6 = arith.constant 0 : i32
    %12 = arith.cmpi eq, %arg1, %c0_i32_6 : i32
    %13 = arith.extui %12 : i1 to i32
    %c0_i32_7 = arith.constant 0 : i32
    %14 = arith.cmpi ne, %13, %c0_i32_7 : i32
    scf.if %14 {
      %c0_8 = arith.constant 0 : index
      %c0_9 = arith.constant 0 : index
      %15 = vector.load %arg5[%c0_8, %c0_9] : memref<1x512xf32, #tpu.memory_space<vmem>>, vector<1x512xf32>
      %c0_10 = arith.constant 0 : index
      %c0_11 = arith.constant 0 : index
      %16 = vector.load %arg3[%c0_10, %c0_11] : memref<512x256xf32, #tpu.memory_space<vmem>>, vector<512x256xf32>
      %cst_12 = arith.constant dense<0.000000e+00> : vector<1x256xf32>
      %17 = tpu.matmul %15, %16, %cst_12 {dimension_numbers = #tpu.dot_dimension_numbers<[1], [0], [0], [1], [0, 0, 1, 1], [], []>, precision = #tpu.contract_precision<fp32>} : vector<1x512xf32>, vector<512x256xf32>, vector<1x256xf32> -> vector<1x256xf32>
      %c0_13 = arith.constant 0 : index
      %c0_14 = arith.constant 0 : index
      %c0_15 = arith.constant 0 : index
      %18 = vector.load %arg4[%c0_13, %c0_14, %c0_15] : memref<1x1x256xf32, #tpu.memory_space<vmem>>, vector<1x1x256xf32>
      %19 = vector.shape_cast %18 : vector<1x1x256xf32> to vector<1x256xf32>
      %20 = vector.shape_cast %17 : vector<1x256xf32> to vector<1x1x256xf32>
      tpu.vector_store %arg4[%c0_13, %c0_14, %c0_15], %20 {strides = array<i32>} : memref<1x1x256xf32, #tpu.memory_space<vmem>>, vector<1x1x256xf32>,
    } else {
    }
    return
  }
  func.func @transform_0(%arg0: i32, %arg1: i32) -> (i32, i32, i32) {
    %c0_i32 = arith.constant 0 : i32
    %c0_i32_0 = arith.constant 0 : i32
    return %arg0, %arg1, %c0_i32 : i32, i32, i32
  }
  func.func @transform_1(%arg0: i32, %arg1: i32) -> (i32, i32) {
    %c0_i32 = arith.constant 0 : i32
    %c0_i32_0 = arith.constant 0 : i32
    %c0_i32_1 = arith.constant 0 : i32
    return %c0_i32, %c0_i32_0 : i32, i32
  }
  func.func @transform_2(%arg0: i32, %arg1: i32) -> (i32, i32, i32) {
    %c0_i32 = arith.constant 0 : i32
    %c0_i32_0 = arith.constant 0 : i32
    %c0_i32_1 = arith.constant 0 : i32
    return %arg0, %c0_i32, %c0_i32_0 : i32, i32, i32
  }
}

module attributes {stable_mosaic.version = 11 : i64} {
  func.func @_apply_scale_kernel(%arg0: i32, %arg1: i32, %arg2: memref<1x4x256xf32, #tpu.memory_space<vmem>>, %arg3: memref<1x1x256xf32, #tpu.memory_space<vmem>>, %arg4: memref<1x4x256xf32, #tpu.memory_space<vmem>>) attributes {dimension_semantics = [#tpu.dimension_semantics<parallel>, #tpu.dimension_semantics<parallel>], iteration_bounds = array<i64: 2, 1>, scalar_prefetch = 0 : i64, scratch_operands = 0 : i64, tpu.core_type = #tpu.core_type<tc>, window_params = [{transform_indices = @transform_0, window_bounds = array<i64: 1, 4, 256>}, {transform_indices = @transform_1, window_bounds = array<i64: 1, 1, 256>}, {transform_indices = @transform_2, window_bounds = array<i64: 1, 4, 256>}]} {
    %c0 = arith.constant 0 : index
    %c0_0 = arith.constant 0 : index
    %c0_1 = arith.constant 0 : index
    %0 = vector.load %arg2[%c0, %c0_0, %c0_1] : memref<1x4x256xf32, #tpu.memory_space<vmem>>, vector<1x4x256xf32>
    %c0_2 = arith.constant 0 : index
    %c0_3 = arith.constant 0 : index
    %c0_4 = arith.constant 0 : index
    %1 = vector.load %arg3[%c0_2, %c0_3, %c0_4] : memref<1x1x256xf32, #tpu.memory_space<vmem>>, vector<1x1x256xf32>
    %2 = vector.broadcast %1 : vector<1x1x256xf32> to vector<1x4x256xf32>
    %3 = arith.mulf %0, %2 : vector<1x4x256xf32>
    %c0_5 = arith.constant 0 : index
    %c0_6 = arith.constant 0 : index
    %c0_7 = arith.constant 0 : index
    %4 = vector.load %arg4[%c0_5, %c0_6, %c0_7] : memref<1x4x256xf32, #tpu.memory_space<vmem>>, vector<1x4x256xf32>
    tpu.vector_store %arg4[%c0_5, %c0_6, %c0_7], %3 {strides = array<i32>} : memref<1x4x256xf32, #tpu.memory_space<vmem>>, vector<1x4x256xf32>,
    return
  }
  func.func @transform_0(%arg0: i32, %arg1: i32) -> (i32, i32, i32) {
    %c0_i32 = arith.constant 0 : i32
    %c0_i32_0 = arith.constant 0 : i32
    return %arg0, %arg1, %c0_i32 : i32, i32, i32
  }
  func.func @transform_1(%arg0: i32, %arg1: i32) -> (i32, i32, i32) {
    %c0_i32 = arith.constant 0 : i32
    %c0_i32_0 = arith.constant 0 : i32
    %c0_i32_1 = arith.constant 0 : i32
    return %arg0, %c0_i32, %c0_i32_0 : i32, i32, i32
  }
  func.func @transform_2(%arg0: i32, %arg1: i32) -> (i32, i32, i32) {
    %c0_i32 = arith.constant 0 : i32
    %c0_i32_0 = arith.constant 0 : i32
    return %arg0, %arg1, %c0_i32 : i32, i32, i32
  }
}

</mosaic_0001>

<bundles_post_ra>
// kernel: spatial_attention.3
= control target key start
LH: loop header
LB: loop body
LE: loop exit
PB: predicated region body
PF: predicated region fallthrough
CT: control target
= control target key end

     0   :  { %s389_s9 = smov 0   ;;  %s391_s10 = smov 0   ;;  %s418_s0 = inlined_call_operand.vmem [shape: f32[2,4,256], index: 0, kind: input, shape index: {}]   ;;  %s419_s1 = inlined_call_operand.vmem [shape: f32[2,1,256], index: 1, kind: input, shape index: {}]   ;;  %s420_s2 = inlined_call_operand.vmem [shape: f32[2,4,256], index: 2, kind: output, shape index: {}]  }
   0x1   :  { %s393_s11 = smov 0  }
   0x2 LB: > { %s24_s12 = sadd.s32 1, %s368_s10  ;;  %p316_p0 = scmp.ge.s32.totalorder %s372_s11, 1  ;;  %s372_s11 = sphi %s393_s11, %s12_s11   ;;  %s368_s10 = sphi %s391_s10, %s422_s10   ;;  %s364_s9 = sphi %s389_s9, %s421_s9  }
   0x3   : > { %p26_p1 = scmp.ge.s32.totalorder %s24_s12, 2  ;;  %p141_p2 = scmp.lt.s32.totalorder %s372_s11, 3 }
   0x5   : > { %s424_s12 = smov (%p26_p1, %s24_s12), 0  ;;  %p142_p3 = pnand %p316_p0, %p141_p2 }
   0x6   : > { %p175_p4 = scmp.lt.s32.totalorder (!%p142_p3), %s364_s9, 1 }
   0x7   : > { %145 = sbr.rel (%p142_p3) target bundleno = 24 (0x18), region = 28 }
   0xc   : > { %s426_s9 = smov (!%p175_p4, %s364_s9), 1  ;;  %vm203_vm0 = vcmask 1043456  }
   0xd   : > { %s324_s13 = sshll.u32 %s426_s9, 3  ;;  %s319_s14 = sshll.u32 %s426_s9, 1 }
   0xe   : > { %s187_s17 = scalar_lea.vmem %s419_s1, %s319_s14  ;;  %s183_s20 = scalar_lea.vmem %s418_s0, %s324_s13 }
   0xf   : > { %v198_v0 = vld [vmem:[%s187_s17] sm:$0x3]  ;;  %s196_s23 = scalar_lea.vmem %s420_s2, %s324_s13 }
  0x10   : > { %v200_v1 = vperm.slane %v198_v0, 0  ;;  %v201_v2 = vperm.slane %v198_v0, 1  ;;  %v197_v3 = vld [vmem:[%s183_s20] sm:$0xff] }
  0x12   : > { %v202_v4 = vrot.slane %v201_v2, 4 }
  0x14   : > { %v204_v5 = vsel %vm203_vm0, %v200_v1, %v202_v4 }
  0x15   : > { %v206_v6 = vmul.f32 %v204_v5, %v197_v3 }
  0x17   : > { %207 = vst [vmem:[%s196_s23] sm:$0xff] %v206_v6 }
  0x18 PF: > { %s12_s11 = sadd.s32 1, %s372_s11   ;;  %s421_s9 = smov %s368_s10 }
  0x19   : > { %p9_p5 = scmp.ge.s32.totalorder %s12_s11, 4   ;;  %s422_s10 = smov %s424_s12 }
  0x1b   :  { %11 = sbr.rel (!%p9_p5) target bundleno = 2 (0x2), region = 61 }

// kernel: spatial_attention.2
= control target key start
LH: loop header
LB: loop body
LE: loop exit
PB: predicated region body
PF: predicated region fallthrough
CT: control target
= control target key end

     0   :  { %s3279_s9 = smov 0   ;;  %s3281_s10 = smov 0   ;;  %s5781_s0 = inlined_call_operand.vmem [shape: f32[2,4,256], index: 0, kind: input, shape index: {}]   ;;  %s5782_s1 = inlined_call_operand.vmem [shape: f32[512,256], index: 1, kind: input, shape index: {}]   ;;  %s5783_s2 = inlined_call_operand.vmem [shape: f32[2,1,256], index: 2, kind: output, shape index: {}]  }
   0x1   :  { %s3283_s11 = smov 0  }
   0x2 LB: > { %s24_s12 = sadd.s32 1, %s3258_s10  ;;  %p3209_p0 = scmp.ge.s32.totalorder %s3262_s11, 1  ;;  %s3262_s11 = sphi %s3283_s11, %s12_s11   ;;  %s3258_s10 = sphi %s3281_s10, %s6063_s10   ;;  %s3254_s9 = sphi %s3279_s9, %s6062_s9  }
   0x3   : > { %p26_p1 = scmp.ge.s32.totalorder %s24_s12, 2  ;;  %p130_p2 = scmp.lt.s32.totalorder %s3262_s11, 3 }
   0x5   : > { %s6065_s12 = smov (%p26_p1, %s24_s12), 0  ;;  %p131_p3 = pnand %p3209_p0, %p130_p2 }
   0x7   : > { %134 = sbr.rel (%p131_p3) target bundleno = 565 (0x235), region = 28 }
   0xc   : > { %v289_v0 = vld [vmem:[%s5782_s1 + $0xf0] sm:$0xff]  ;;  %v287_v1 = vld [vmem:[%s5782_s1 + $0xe0] sm:$0xff]  ;;  %p155_p4 = scmp.lt.s32.totalorder %s3254_s9, 1  ;;  %vm175_vm0 = vcmask 1043456   ;;  %vm216_vm1 = vcmask 1040384  }
   0xd   : > { %v285_v2 = vld [vmem:[%s5782_s1 + $0xd0] sm:$0xff]  ;;  %v3309_v3 = vand.u32 4294901760, %v289_v0  ;;  %v3311_v4 = vand.u32 4294901760, %v287_v1  ;;  %v283_v6 = vld [vmem:[%s5782_s1 + $0xc0] sm:$0xff] }
   0xe   : > { %v3313_v5 = vand.u32 4294901760, %v285_v2  ;;  %v281_v7 = vld [vmem:[%s5782_s1 + $0xb0] sm:$0xff]  ;;  %v279_v8 = vld [vmem:[%s5782_s1 + $0xa0] sm:$0xff]  ;;  %v3324_v9 = vand.u32 4294901760, %v283_v6  ;;  %s6067_s9 = smov (!%p155_p4, %s3254_s9), 1 }
   0xf   : > { %v3326_v10 = vand.u32 4294901760, %v281_v7  ;;  %v3328_v11 = vand.u32 4294901760, %v279_v8  ;;  %v277_v12 = vld [vmem:[%s5782_s1 + $0x90] sm:$0xff]  ;;  %v275_v13 = vld [vmem:[%s5782_s1 + $0x80] sm:$0xff]  ;;  %397 = vmatpush.msra.mxu0 %v3309_v3  ;;  %v3338_v14 = vsub.f32 %v289_v0, %v3309_v3  ;;  %v3341_v15 = vsub.f32 %v287_v1, %v3311_v4  ;;  %593 = vmatpush.msra.mxu3 %v3309_v3  ;;  %s3215_s5 = sshll.u32 %s6067_s9, 3 }
  0x10   : > { %v3345_v16 = vsub.f32 %v285_v2, %v3313_v5  ;;  %v3347_v17 = vand.u32 4294901760, %v277_v12  ;;  %v273_v18 = vld [vmem:[%s5782_s1 + $0x70] sm:$0xff]  ;;  %v3358_v19 = vsub.f32 %v283_v6, %v3324_v9  ;;  %v3363_v21 = vand.u32 4294901760, %v275_v13  ;;  %v271_v29 = vld [vmem:[%s5782_s1 + $0x60] sm:$0xff]  ;;  %s163_s14 = scalar_lea.vmem %s5781_s0, %s3215_s5  ;;  %s3212_s5 = sshll.u32 %s6067_s9, 1 }
  0x11   : > { %v3361_v20 = vsub.f32 %v281_v7, %v3326_v10  ;;  %v3366_v22 = vsub.f32 %v279_v8, %v3328_v11  ;;  %399 = vmatpush.msra.mxu0 %v3311_v4  ;;  %540 = vmatpush.msra.mxu2 %v3338_v14  ;;  %v5795_v23 = vand.u32 4294901760, %v3338_v14  ;;  %v5794_v24 = vand.u32 4294901760, %v3341_v15  ;;  %v269_v36 = vld [vmem:[%s5782_s1 + $0x50] sm:$0xff]  ;;  %v267_v41 = vld [vmem:[%s5782_s1 + $0x40] sm:$0xff]  ;;  %s167_s8 = scalar_lea.vmem %s5783_s2, %s3212_s5 }
  0x12   : > { %v5793_v25 = vand.u32 4294901760, %v3345_v16  ;;  %595 = vmatpush.msra.mxu3 %v3311_v4  ;;  %v5792_v26 = vand.u32 4294901760, %v3358_v19  ;;  %v3375_v27 = vand.u32 4294901760, %v273_v18  ;;  %v3378_v28 = vsub.f32 %v277_v12, %v3347_v17  ;;  %v168_v42 = vld [vmem:[%s163_s14] sm:$0xff]  ;;  %v265_v51 = vld [vmem:[%s5782_s1 + $0x30] sm:$0xff] }
  0x13   : > { %401 = vmatpush.msra.mxu0 %v3313_v5  ;;  %543 = vmatpush.msra.mxu2 %v3341_v15  ;;  %v440_v30 = vsub.f32 %v3338_v14, %v5795_v23  ;;  %v446_v31 = vsub.f32 %v3341_v15, %v5794_v24  ;;  %v5791_v33 = vand.u32 4294901760, %v3361_v20  ;;  %v5790_v34 = vand.u32 4294901760, %v3366_v22  ;;  %170 = vst [vmem:[#allocation1] ss:$2 sm:$0xff] %v168_v42  ;;  %v263_v55 = vld [vmem:[%s5782_s1 + $0x20] sm:$0xff]  ;;  %v261_v56 = vld [vmem:[%s5782_s1 + $0x10] sm:$0xff] }
  0x14   : > { %v452_v32 = vsub.f32 %v3345_v16, %v5793_v25  ;;  %597 = vmatpush.msra.mxu3 %v3313_v5  ;;  %v3399_v35 = vsub.f32 %v275_v13, %v3363_v21  ;;  %v458_v39 = vsub.f32 %v3358_v19, %v5792_v26  ;;  %v3412_v40 = vand.u32 4294901760, %v271_v29  ;;  %v259_v61 = vld [vmem:[%s5782_s1] sm:$0xff]  ;;  %v321_v62 = vld [vmem:[%s5782_s1 + $0x1f0] sm:$0xff] }
  0x15   : > { %403 = vmatpush.msra.mxu0 %v3324_v9  ;;  %v441_v37 = vand.u32 4294901760, %v440_v30  ;;  %546 = vmatpush.msra.mxu2 %v3345_v16  ;;  %v447_v38 = vand.u32 4294901760, %v446_v31  ;;  %v3419_v43 = vsub.f32 %v273_v18, %v3375_v27  ;;  %v464_v45 = vsub.f32 %v3361_v20, %v5791_v33  ;;  %v319_v2 = vld [vmem:[%s5782_s1 + $0x1e0] sm:$0xff]  ;;  %v317_v6 = vld [vmem:[%s5782_s1 + $0x1d0] sm:$0xff] }
  0x16   : > { %599 = vmatpush.msra.mxu3 %v3324_v9  ;;  %v453_v44 = vand.u32 4294901760, %v452_v32  ;;  %v3425_v46 = vand.u32 4294901760, %v269_v36  ;;  %v5788_v47 = vand.u32 4294901760, %v3378_v28  ;;  %v470_v48 = vsub.f32 %v3366_v22, %v5790_v34 }
  0x17   : > { %405 = vmatpush.msra.mxu0 %v3326_v10  ;;  %442 = vmatpush.msra.mxu1 %v441_v37  ;;  %v3433_v49 = vand.u32 4294901760, %v267_v41  ;;  %v5787_v50 = vand.u32 4294901760, %v3399_v35  ;;  %v459_v52 = vand.u32 4294901760, %v458_v39  ;;  %v3441_v53 = vsub.f32 %v271_v29, %v3412_v40  ;;  %v315_v39 = vld [vmem:[%s5782_s1 + $0x1c0] sm:$0xff] }
  0x18   : > { %549 = vmatpush.msra.mxu2 %v3358_v19  ;;  %601 = vmatpush.msra.mxu3 %v3326_v10  ;;  %v5786_v54 = vand.u32 4294901760, %v3419_v43  ;;  %v465_v57 = vand.u32 4294901760, %v464_v45  ;;  %v476_v58 = vsub.f32 %v3378_v28, %v5788_v47  ;;  %v3456_v59 = vand.u32 4294901760, %v265_v51 }
  0x19   : > { %407 = vmatpush.msra.mxu0 %v3328_v11  ;;  %448 = vmatpush.msra.mxu1 %v447_v38  ;;  %v3459_v60 = vsub.f32 %v269_v36, %v3425_v46  ;;  %v471_v63 = vand.u32 4294901760, %v470_v48  ;;  %v482_v0 = vsub.f32 %v3399_v35, %v5787_v50  ;;  %v3473_v1 = vsub.f32 %v267_v41, %v3433_v49  ;;  %v313_v48 = vld [vmem:[%s5782_s1 + $0x1b0] sm:$0xff] }
  0x1a   : > { %552 = vmatpush.msra.mxu2 %v3361_v20  ;;  %603 = vmatpush.msra.mxu3 %v3328_v11  ;;  %5891 = vst [vmem:[#allocation3_spill] sm:$0xff] %v3456_v59  ;;  %v488_v7 = vsub.f32 %v3419_v43, %v5786_v54  ;;  %v3485_v8 = vand.u32 4294901760, %v263_v55  ;;  %v5784_v12 = vand.u32 4294901760, %v3441_v53  ;;  %v3488_v13 = vand.u32 4294901760, %v261_v56 }
  0x1b   : > { %409 = vmatpush.msra.mxu0 %v3347_v17  ;;  %454 = vmatpush.msra.mxu1 %v453_v44  ;;  %v3490_v18 = vld.sshfl [vmem:[#allocation1] sm:$0xff pattern:$0x75316420]  ;;  %v3494_v29 = vand.u32 4294901760, %v259_v61  ;;  %v3496_v30 = vand.u32 4294901760, %v321_v62  ;;  %v477_v32 = vand.u32 4294901760, %v476_v58  ;;  %v3503_v37 = vsub.f32 %v265_v51, %v3456_v59 }
  0x1c   : > { %555 = vmatpush.msra.mxu2 %v3366_v22  ;;  %605 = vmatpush.msra.mxu3 %v3347_v17  ;;  %5892 = vst [vmem:[#allocation4_spill] sm:$0xff] %v3485_v8  ;;  %v3498_v31 = vld.sshfl [vmem:[#allocation1 + $0x8] sm:$0xff pattern:$0x75316420]  ;;  %v5785_v36 = vand.u32 4294901760, %v3459_v60  ;;  %v3505_v38 = vand.u32 4294901760, %v319_v2 }
  0x1d   : > { %411 = vmatpush.msra.mxu0 %v3363_v21  ;;  %460 = vmatpush.msra.mxu1 %v459_v52  ;;  %5893 = vst [vmem:[#allocation5_spill] sm:$0xff] %v3488_v13  ;;  %v483_v41 = vand.u32 4294901760, %v482_v0  ;;  %v5789_v44 = vand.u32 4294901760, %v3473_v1  ;;  %v3513_v45 = vand.u32 4294901760, %v317_v6  ;;  %v489_v51 = vand.u32 4294901760, %v488_v7 }
  0x1e   : > { %558 = vmatpush.msra.mxu2 %v3378_v28  ;;  %607 = vmatpush.msra.mxu3 %v3363_v21  ;;  %5894 = vst [vmem:[#allocation6_spill] sm:$0xff] %v3494_v29  ;;  %v3523_v52 = vsub.f32 %v263_v55, %v3485_v8  ;;  %v3531_v58 = vsub.f32 %v259_v61, %v3494_v29  ;;  %v3539_v7 = vand.u32 4294901760, %v315_v39  ;;  %v311_v55 = vld [vmem:[%s5782_s1 + $0x1a0] sm:$0xff]  ;;  %v5796_v61 = vand.u32 4294901760, %v3503_v37 }
  0x1f   : > { %413 = vmatpush.msra.mxu0 %v3375_v27  ;;  %466 = vmatpush.msra.mxu1 %v465_v57  ;;  %190 = vst [vmem:[#allocation1] ss:$2 sm:$0xff] %v168_v42  ;;  %v494_v42 = vsub.f32 %v3441_v53, %v5784_v12  ;;  %v3526_v57 = vsub.f32 %v261_v56, %v3488_v13  ;;  %v3568_v47 = vand.u32 4294901760, %v311_v55 }
  0x20   : > { %561 = vmatpush.msra.mxu2 %v3399_v35  ;;  %609 = vmatpush.msra.mxu3 %v3375_v27  ;;  %v3537_v0 = vsub.f32 %v319_v2, %v3505_v38  ;;  %v500_v56 = vsub.f32 %v3459_v60, %v5785_v36  ;;  %v3552_v2 = vand.u32 4294901760, %v313_v48  ;;  %v506_v12 = vsub.f32 %v3473_v1, %v5789_v44  ;;  %v309_v36 = vld [vmem:[%s5782_s1 + $0x190] sm:$0xff] }
  0x21   : > { %415 = vmatpush.msra.mxu0 %v3412_v40  ;;  %472 = vmatpush.msra.mxu1 %v471_v63  ;;  %v3534_v63 = vsub.f32 %v321_v62, %v3496_v30  ;;  %v3550_v62 = vsub.f32 %v317_v6, %v3513_v45  ;;  %v495_v6 = vand.u32 4294901760, %v494_v42  ;;  %v5798_v54 = vand.u32 4294901760, %v3523_v52 }
  0x22   : > { %564 = vmatpush.msra.mxu2 %v3419_v43  ;;  %611 = vmatpush.msra.mxu3 %v3412_v40  ;;  %5896 = vst [vmem:[#allocation8_spill] sm:$0xff] %v3537_v0  ;;  %v5797_v50 = vand.u32 4294901760, %v3526_v57  ;;  %v5803_v44 = vand.u32 4294901760, %v3531_v58  ;;  %v5802_v34 = vand.u32 4294901760, %v3537_v0  ;;  %v3576_v33 = vsub.f32 %v313_v48, %v3552_v2 }
  0x23   : > { %5895 = vst [vmem:[#allocation7_spill] sm:$0xff] %v3534_v63  ;;  %417 = vmatpush.msra.mxu0 %v3425_v46  ;;  %478 = vmatpush.msra.mxu1 %v477_v32  ;;  %v3560_v32 = vsub.f32 %v315_v39, %v3539_v7  ;;  %v5801_v39 = vand.u32 4294901760, %v3534_v63  ;;  %v501_v42 = vand.u32 4294901760, %v500_v56  ;;  %v512_v26 = vsub.f32 %v3503_v37, %v5796_v61 }
  0x24   : > { %5897 = vst [vmem:[#allocation9_spill] sm:$0xff] %v3550_v62  ;;  %567 = vmatpush.msra.mxu2 %v3441_v53  ;;  %613 = vmatpush.msra.mxu3 %v3425_v46  ;;  %v3586_v24 = vand.u32 4294901760, %v309_v36  ;;  %v507_v48 = vand.u32 4294901760, %v506_v12  ;;  %v524_v56 = vsub.f32 %v3526_v57, %v5797_v50  ;;  %v3599_v61 = vsub.f32 %v311_v55, %v3568_v47  ;;  %v305_v12 = vld [vmem:[%s5782_s1 + $0x170] sm:$0xff] }
  0x25   : > { %5898 = vst [vmem:[#allocation10_spill] sm:$0xff] %v3560_v32  ;;  %419 = vmatpush.msra.mxu0 %v3433_v49  ;;  %484 = vmatpush.msra.mxu1 %v483_v41  ;;  %v307_v41 = vld [vmem:[%s5782_s1 + $0x180] sm:$0xff]  ;;  %v3614_v50 = vsub.f32 %v3531_v58, %v5803_v44  ;;  %v787_v55 = vsub.f32 %v3537_v0, %v5802_v34  ;;  %v513_v23 = vand.u32 4294901760, %v512_v26  ;;  %v5902_v34 = vand.u32 4294901760, %v3560_v32 }
  0x26   : > { %570 = vmatpush.msra.mxu2 %v3459_v60  ;;  %615 = vmatpush.msra.mxu3 %v3433_v49  ;;  %5899 = vst [vmem:[#allocation11_spill] sm:$0xff] %v3576_v33  ;;  %v3601_v25 = vand.u32 4294901760, %v307_v41  ;;  %v303_v26 = vld [vmem:[%s5782_s1 + $0x160] sm:$0xff] }
  0x27   : > { %421 = vmatpush.msra.mxu0 %v3456_v59  ;;  %490 = vmatpush.msra.mxu1 %v489_v51  ;;  %v518_v51 = vsub.f32 %v3523_v52, %v5798_v54  ;;  %5900 = vst [vmem:[#allocation12_spill] sm:$0xff] %v3599_v61  ;;  %v3634_v44 = vsub.f32 %v3560_v32, %v5902_v34  ;;  %v3636_v54 = vand.u32 4294901760, %v305_v12  ;;  %v5903_v34 = vand.u32 4294901760, %v3338_v14  ;;  %v192_v14 = vld.sshfl [vmem:[#allocation1 + $0x8] sm:$0xff pattern:$0x75316420] }
  0x28   : > { %573 = vmatpush.msra.mxu2 %v3473_v1  ;;  %617 = vmatpush.msra.mxu3 %v3456_v59  ;;  %v531_v0 = vand.u32 4294901760, %v3614_v50  ;;  %v301_v50 = vld [vmem:[%s5782_s1 + $0x150] sm:$0xff] }
  0x29   : > { %423 = vmatpush.msra.mxu0 %v3485_v8  ;;  %496 = vmatpush.msra.mxu1 %v495_v6  ;;  %v781_v6 = vsub.f32 %v3534_v63, %v5801_v39  ;;  %v3627_v39 = vsub.f32 %v309_v36, %v3586_v24  ;;  %v525_v36 = vand.u32 4294901760, %v524_v56  ;;  %v5904_v63 = vand.u32 4294901760, %v3576_v33 }
  0x2a   : > { %576 = vmatpush.msra.mxu2 %v3503_v37  ;;  %619 = vmatpush.msra.mxu3 %v3485_v8  ;;  %v5901_v8 = vand.u32 4294901760, %v3550_v62  ;;  %v3658_v56 = vand.u32 4294901760, %v303_v26 }
  0x2b   : > { %425 = vmatpush.msra.mxu0 %v3488_v13  ;;  %502 = vmatpush.msra.mxu1 %v501_v42  ;;  %v5816_v42 = vand.u32 4294901760, %v3599_v61  ;;  %v782_v32 = vand.u32 4294901760, %v781_v6  ;;  %v176_v6 = vsel %vm175_vm0, %v3490_v18, -inf  ;;  %v5907_v18 = vand.u32 4294901760, %v3627_v39 }
  0x2c   : > { %v3624_v59 = vsub.f32 %v3550_v62, %v5901_v8  ;;  %579 = vmatpush.msra.mxu2 %v3523_v52  ;;  %621 = vmatpush.msra.mxu3 %v3488_v13  ;;  %v519_v8 = vand.u32 4294901760, %v518_v51  ;;  %v3644_v62 = vsub.f32 %v307_v41, %v3601_v25  ;;  %v788_v13 = vand.u32 4294901760, %v787_v55  ;;  %v191_v51 = vld.sshfl [vmem:[#allocation1] sm:$0xff pattern:$0x75316420] }
  0x2d   : > { %427 = vmatpush.msra.mxu0 %v3494_v29  ;;  %508 = vmatpush.msra.mxu1 %v507_v48  ;;  %v3653_v48 = vsub.f32 %v3576_v33, %v5904_v63  ;;  %v5905_v63 = vand.u32 4294901760, %v3341_v15  ;;  %v177_v55 = vrot.slane %v176_v6, 4  ;;  %v3678_v15 = vsub.f32 %v3599_v61, %v5816_v42 }
  0x2e   : > { %582 = vmatpush.msra.mxu2 %v3526_v57  ;;  %623 = vmatpush.msra.mxu3 %v3494_v29  ;;  %v794_v41 = vand.u32 4294901760, %v3624_v59  ;;  %v3670_v59 = vsub.f32 %v305_v12, %v3636_v54  ;;  %v3688_v33 = vand.u32 4294901760, %v301_v50  ;;  %v3694_v61 = vsub.f32 %v3627_v39, %v5907_v18 }
  0x2f   : > { %634 = vmatpush.msrb.mxu0 %v5903_v34  ;;  %514 = vmatpush.msra.mxu1 %v513_v23  ;;  %v800_v23 = vand.u32 4294901760, %v3634_v44  ;;  %v183_v34 = vsel %vm175_vm0, %v3498_v31, -inf  ;;  %v299_v44 = vld [vmem:[%s5782_s1 + $0x140] sm:$0xff]  ;;  %v5906_v31 = vand.u32 4294901760, %v3345_v16  ;;  %v178_v29 = vmax.f32 %v176_v6, %v177_v55 }
  0x30   : > { %585 = vmatpush.msra.mxu2 %v3531_v58  ;;  %v184_v12 = vrot.slane %v183_v34, 4  ;;  %783 = vmatpush.msrb.mxu3 %v782_v32  ;;  %v202_v32 = vsel %vm175_vm0, %v192_v14, 0.0  ;;  %v3702_v6 = vand.u32 4294901760, %v299_v44  ;;  %v5909_v14 = vand.u32 4294901760, %v3644_v62 }
  0x31   : > { %638 = vmatpush.msrb.mxu0 %v5905_v63  ;;  %520 = vmatpush.msra.mxu1 %v519_v8  ;;  %v195_v63 = vsel %vm175_vm0, %v191_v51, 0.0  ;;  %v806_v8 = vand.u32 4294901760, %v3653_v48  ;;  %v3697_v51 = vsub.f32 %v303_v26, %v3658_v56  ;;  %v5908_v48 = vand.u32 4294901760, %v3358_v19 }
  0x32   : > { %738 = vmatpush.msrb.mxu2 %v3496_v30  ;;  %v196_v42 = vrot.slane %v195_v63, 4  ;;  %v185_v16 = vmax.f32 %v183_v34, %v184_v12  ;;  %789 = vmatpush.msrb.mxu3 %v788_v13  ;;  %v179_v55 = vrot.slane %v178_v29, 2  ;;  %v203_v18 = vrot.slane %v202_v32, 4 }
  0x33   : > { %642 = vmatpush.msrb.mxu0 %v5906_v31  ;;  %526 = vmatpush.msra.mxu1 %v525_v36  ;;  %v297_v36 = vld [vmem:[%s5782_s1 + $0x130] sm:$0xff]  ;;  %v812_v26 = vand.u32 4294901760, %v3678_v15  ;;  %v3712_v19 = vsub.f32 %v3644_v62, %v5909_v14  ;;  %v5910_v12 = vand.u32 4294901760, %v3361_v20  ;;  %v818_v14 = vand.u32 4294901760, %v3694_v61 }
  0x34   : > { %740 = vmatpush.msrb.mxu2 %v3505_v38  ;;  %v197_v31 = vadd.f32 %v196_v42, %v195_v63  ;;  %v186_v34 = vrot.slane %v185_v16, 2  ;;  %v3719_v42 = vsub.f32 %v301_v50, %v3688_v33  ;;  %v180_v15 = vmax.f32 %v178_v29, %v179_v55  ;;  %795 = vmatpush.msrb.mxu3 %v794_v41  ;;  %v293_v61 = vld [vmem:[%s5782_s1 + $0x110] sm:$0xff] }
  0x35   : > { %646 = vmatpush.msrb.mxu0 %v5908_v48  ;;  %532 = vmatpush.msra.mxu1 %v531_v0  ;;  %v295_v0 = vld [vmem:[%s5782_s1 + $0x120] sm:$0xff]  ;;  %v204_v48 = vadd.f32 %v203_v18, %v202_v32  ;;  %v5911_v50 = vand.u32 4294901760, %v3366_v22  ;;  %v3733_v13 = vsub.f32 %v299_v44, %v3702_v6  ;;  %v5912_v41 = vand.u32 4294901760, %v3670_v59 }
  0x36   : > { %742 = vmatpush.msrb.mxu2 %v3513_v45  ;;  %v198_v63 = vrot.slane %v197_v31, 2  ;;  %v181_v29 = vrot.slane %v180_v15, 1  ;;  %801 = vmatpush.msrb.mxu3 %v800_v23  ;;  %v219_v18 = vlaneseq  ;;  %v5913_v44 = vand.u32 4294901760, %v3378_v28  ;;  %v291_v23 = vld [vmem:[%s5782_s1 + $0x100] sm:$0xff] }
  0x37   : > { %650 = vmatpush.msrb.mxu0 %v5910_v12  ;;  %701 = vmatpush.msrb.mxu1 %v3309_v3  ;;  %v3727_v12 = vand.u32 4294901760, %v297_v36  ;;  %v187_v3 = vmax.f32 %v185_v16, %v186_v34  ;;  %v205_v55 = vrot.slane %v204_v48, 2  ;;  %v829_v22 = vsub.f32 %v3670_v59, %v5912_v41 }
  0x38   : > { %744 = vmatpush.msrb.mxu2 %v3539_v7  ;;  %v199_v32 = vadd.f32 %v198_v63, %v197_v31  ;;  %v3742_v16 = vand.u32 4294901760, %v295_v0  ;;  %v824_v31 = vand.u32 4294901760, %v3712_v19  ;;  %807 = vmatpush.msrb.mxu3 %v806_v8  ;;  %v182_v28 = vmax.f32 %v180_v15, %v181_v29 }
  0x39   : > { %654 = vmatpush.msrb.mxu0 %v5911_v50  ;;  %703 = vmatpush.msrb.mxu1 %v3311_v4  ;;  %v188_v4 = vrot.slane %v187_v3, 1  ;;  %v206_v50 = vadd.f32 %v205_v55, %v204_v48  ;;  %v3754_v41 = vsub.f32 %v297_v36, %v3727_v12  ;;  %v3756_v20 = vand.u32 4294901760, %v293_v61 }
  0x3a   : > { %746 = vmatpush.msrb.mxu2 %v3552_v2  ;;  %v200_v63 = vrot.slane %v199_v32, 1  ;;  %v5915_v19 = vand.u32 4294901760, %v3697_v51  ;;  %v846_v55 = vand.u32 4294901760, %v3733_v13  ;;  %813 = vmatpush.msrb.mxu3 %v812_v26  ;;  %vm3766_vm2 = vcmp.lt.s32.totalorder %v219_v18, 256 }
  0x3b   : > { %658 = vmatpush.msrb.mxu0 %v5913_v44  ;;  %705 = vmatpush.msrb.mxu1 %v3313_v5  ;;  %v189_v44 = vmax.f32 %v187_v3, %v188_v4  ;;  %v5914_v5 = vand.u32 4294901760, %v3399_v35  ;;  %v207_v34 = vrot.slane %v206_v50, 1  ;;  %v5916_v36 = vmov 0 }
  0x3c   : > { %748 = vmatpush.msrb.mxu2 %v3568_v47  ;;  %v835_v48 = vsub.f32 %v3697_v51, %v5915_v19  ;;  %v5917_v36 = vsel %vm3766_vm2, 4294967295, %v5916_v36  ;;  %v3771_v35 = vsub.f32 %v295_v0, %v3742_v16  ;;  %v5919_v15 = vand.u32 4294901760, %v3419_v43  ;;  %819 = vmatpush.msrb.mxu3 %v818_v14 }
  0x3d   : > { %662 = vmatpush.msrb.mxu0 %v5914_v5  ;;  %707 = vmatpush.msrb.mxu1 %v3324_v9  ;;  %v215_v8 = vrot.slane %v189_v44, 7  ;;  %5918 = vst [vmem:[#allocation13_spill] sm:$0xff] %v5917_v36  ;;  %v3773_v9 = vand.u32 4294901760, %v291_v23  ;;  %v830_v3 = vand.u32 4294901760, %v829_v22  ;;  %v201_v29 = vadd.f32 %v200_v63, %v199_v32 }
  0x3e   : > { %750 = vmatpush.msrb.mxu2 %v3586_v24  ;;  %v208_v4 = vadd.f32 %v207_v34, %v206_v50  ;;  %v5920_v26 = vand.u32 4294901760, %v3719_v42  ;;  %v852_v0 = vand.u32 4294901760, %v3754_v41  ;;  %v3785_v5 = vsub.f32 %v293_v61, %v3756_v20  ;;  %825 = vmatpush.msrb.mxu3 %v824_v31 }
  0x3f   : > { %666 = vmatpush.msrb.mxu0 %v5919_v15  ;;  %709 = vmatpush.msrb.mxu1 %v3326_v10  ;;  %v217_v44 = vsel %vm216_vm1, %v182_v28, %v215_v8  ;;  %v5921_v43 = vand.u32 4294901760, %v3441_v53  ;;  %v836_v14 = vand.u32 4294901760, %v835_v48  ;;  %v847_v32 = vsub.f32 %v3733_v13, %v846_v55 }
  0x40   : > { %752 = vmatpush.msrb.mxu2 %v3601_v25  ;;  %v841_v18 = vsub.f32 %v3719_v42, %v5920_v26  ;;  %223 = vst.msk [vmem:[#allocation2] sm:$0x3] %vm3766_vm2, %v217_v44  ;;  %v226_v10 = vrot.slane %v208_v4, 7  ;;  %v858_v61 = vand.u32 4294901760, %v3771_v35  ;;  %v3798_v22 = vsub.f32 %v291_v23, %v3773_v9  ;;  %831 = vmatpush.msrb.mxu3 %v830_v3  ;;  %v5930_v4 = vld [vmem:[#allocation3_spill] sm:$0xff] }
  0x41   : > { %670 = vmatpush.msrb.mxu0 %v5921_v43  ;;  %711 = vmatpush.msrb.mxu1 %v3328_v11  ;;  %v5922_v53 = vand.u32 4294901760, %v3459_v60  ;;  %v853_v34 = vsub.f32 %v3754_v41, %v852_v0  ;;  %v864_v63 = vand.u32 4294901760, %v3785_v5  ;;  %v5923_v60 = vand.u32 4294901760, %v3473_v1  ;;  %v5936_v43 = vld [vmem:[#allocation7_spill] sm:$0xff] }
  0x42   : > { %754 = vmatpush.msrb.mxu2 %v3636_v54  ;;  %v227_v11 = vsel %vm216_vm1, %v201_v29, %v226_v10  ;;  %v842_v31 = vand.u32 4294901760, %v841_v18  ;;  %837 = vmatpush.msrb.mxu3 %v836_v14  ;;  %v859_v50 = vsub.f32 %v3771_v35, %v858_v61  ;;  %v870_v23 = vand.u32 4294901760, %v3798_v22  ;;  %v5938_v14 = vld [vmem:[#allocation5_spill] sm:$0xff] }
  0x43   : > { %674 = vmatpush.msrb.mxu0 %v5922_v53  ;;  %713 = vmatpush.msrb.mxu1 %v3347_v17  ;;  %229 = vst.msk [vmem:[#allocation2 + $0x2] sm:$0x3] %vm3766_vm2, %v227_v11  ;;  %v848_v17 = vand.u32 4294901760, %v847_v32  ;;  %v5924_v28 = vand.u32 4294901760, %v3503_v37  ;;  %v854_v1 = vand.u32 4294901760, %v853_v34  ;;  %v5925_v19 = vand.u32 4294901760, %v3523_v52 }
  0x44   : > { %756 = vmatpush.msrb.mxu2 %v3658_v56  ;;  %843 = vmatpush.msrb.mxu3 %v842_v31  ;;  %v860_v37 = vand.u32 4294901760, %v859_v50  ;;  %v5926_v48 = vand.u32 4294901760, %v3526_v57  ;;  %v5927_v3 = vand.u32 4294901760, %v3531_v58  ;;  %v5937_v10 = vand.u32 4294901760, %v5936_v43  ;;  %v5939_v11 = vld [vmem:[#allocation8_spill] sm:$0xff]  ;;  %v5944_v50 = vld [vmem:[#allocation9_spill] sm:$0xff] }
  0x45   : > { %678 = vmatpush.msrb.mxu0 %v5923_v60  ;;  %715 = vmatpush.msrb.mxu1 %v3363_v21  ;;  %v865_v21 = vsub.f32 %v3785_v5, %v864_v63  ;;  %v5940_v31 = vand.u32 4294901760, %v5939_v11  ;;  %v5942_v60 = vld [vmem:[#allocation6_spill] sm:$0xff] }
  0x46   : > { %758 = vmatpush.msrb.mxu2 %v3688_v33  ;;  %849 = vmatpush.msrb.mxu3 %v848_v17 }
  0x47   : > { %682 = vmatpush.msrb.mxu0 %v5924_v28  ;;  %717 = vmatpush.msrb.mxu1 %v3375_v27  ;;  %v871_v27 = vsub.f32 %v3798_v22, %v870_v23  ;;  %v866_v52 = vand.u32 4294901760, %v865_v21  ;;  %v5945_v28 = vand.u32 4294901760, %v5944_v50 }
  0x48   : > { %760 = vmatpush.msrb.mxu2 %v3702_v6  ;;  %855 = vmatpush.msrb.mxu3 %v854_v1  ;;  %v5946_v1 = vld [vmem:[#allocation10_spill] sm:$0xff] }
  0x49   : > { %686 = vmatpush.msrb.mxu0 %v5925_v19  ;;  %719 = vmatpush.msrb.mxu1 %v3412_v40  ;;  %v5947_v21 = vand.u32 4294901760, %v5946_v1 }
  0x4a   : > { %762 = vmatpush.msrb.mxu2 %v3727_v12  ;;  %v3836_v8 = vld [vmem:[#allocation2] sm:$0xf]  ;;  %861 = vmatpush.msrb.mxu3 %v860_v37 }
  0x4b   : > { %690 = vmatpush.msrb.mxu0 %v5926_v48  ;;  %721 = vmatpush.msrb.mxu1 %v3425_v46  ;;  %v388_v40 = vperm.slane %v3836_v8, 0  ;;  %v389_v15 = vperm.slane %v3836_v8, 1  ;;  %v872_v46 = vand.u32 4294901760, %v871_v27  ;;  %v353_v27 = vld [vmem:[%s5782_s1 + $0x2f0] sm:$0xff] }
  0x4c   : > { %764 = vmatpush.msrb.mxu2 %v3742_v16  ;;  %867 = vmatpush.msrb.mxu3 %v866_v52 }
  0x4d   : > { %694 = vmatpush.msrb.mxu0 %v5927_v3  ;;  %723 = vmatpush.msrb.mxu1 %v3433_v49  ;;  %v3844_v29 = vand.u32 4294901760, %v388_v40  ;;  %v3847_v57 = vand.u32 4294901760, %v389_v15  ;;  %v5933_v49 = vld [vmem:[#allocation4_spill] sm:$0xff] }
  0x4e   : > { %766 = vmatpush.msrb.mxu2 %v3756_v20  ;;  %873 = vmatpush.msrb.mxu3 %v872_v46 }
  0x4f   : > { %5928 = vst [vmem:[#allocation14_spill] sm:$0xff] %v3844_v29  ;;  %725 = vmatpush.msrb.mxu1 %v5930_v4  ;;  %v3851_v26 = vsub.f32 %v388_v40, %v3844_v29  ;;  %v3855_v58 = vsub.f32 %v389_v15, %v3847_v57  ;;  %v343_v40 = vld [vmem:[%s5782_s1 + $0x2a0] sm:$0xff] }
  0x50   : > { %5929 = vst [vmem:[#allocation15_spill] sm:$0xff] %v3847_v57  ;;  %768 = vmatpush.msrb.mxu2 %v3773_v9  ;;  %534 = vmatmul.f32.vlgmr.msra.gmra.mxu1 %v3844_v29 }
  0x51   : > { %5931 = vst [vmem:[#allocation3_spill] sm:$0xff] %v3851_v26  ;;  %727 = vmatpush.msrb.mxu1 %v5933_v49  ;;  %v3859_v18 = vand.u32 4294901760, %v3851_v26  ;;  %588 = vmatmul.f32.vlgmr.msra.gmra.mxu2 %v3851_v26  ;;  %v3863_v44 = vand.u32 4294901760, %v3855_v58 }
  0x52   : > { %5932 = vst [vmem:[#allocation16_spill] sm:$0xff] %v3855_v58  ;;  %975 = vmatpush.msra.mxu2 %v5937_v10 }
  0x53   : > { %5934 = vst [vmem:[#allocation4_spill] sm:$0xff] %v3859_v18  ;;  %729 = vmatpush.msrb.mxu1 %v5938_v14  ;;  %v431_v32 = vsub.f32 %v3851_v26, %v3859_v18  ;;  %627 = vmatmul.f32.vlgmr.msra.gmra.mxu3 %v3859_v18  ;;  %v772_v53 = vsub.f32 %v3855_v58, %v3863_v44 }
  0x54   : > { %5935 = vst [vmem:[#allocation17_spill] sm:$0xff] %v3863_v44  ;;  %979 = vmatpush.msra.mxu2 %v5940_v31  ;;  %1042 = vmatpush.msra.mxu3 %v3496_v30 }
  0x55   : > { %v3877_v34 = vand.u32 4294901760, %v431_v32  ;;  %731 = vmatpush.msrb.mxu1 %v5942_v60  ;;  %v3880_v17 = vand.u32 4294901760, %v772_v53  ;;  %v333_v53 = vld [vmem:[%s5782_s1 + $0x250] sm:$0xff] }
  0x56   : > { %983 = vmatpush.msra.mxu2 %v5945_v28  ;;  %1044 = vmatpush.msra.mxu3 %v3505_v38 }
  0x57   : > { %5941 = vst [vmem:[#allocation7_spill] sm:$0xff] %v3877_v34  ;;  %934 = vmatpush.msra.mxu1 %v3496_v30  ;;  %433 = vmatmul.f32.vlgmr.msra.gmra.mxu0 %v3877_v34  ;;  %v5948_v30 = vld [vmem:[#allocation11_spill] sm:$0xff] }
  0x58   : > { %5943 = vst [vmem:[#allocation5_spill] sm:$0xff] %v3880_v17  ;;  %881 = vmatpush.msra.mxu0 %v5936_v43  ;;  %1046 = vmatpush.msra.mxu3 %v3513_v45  ;;  %v5949_v19 = vand.u32 4294901760, %v5948_v30 }
  0x59   : > { %936 = vmatpush.msra.mxu1 %v3505_v38  ;;  %774 = vmatmul.f32.vlgmr.msrb.gmra.mxu2 %v3880_v17  ;;  %v5950_v38 = vld [vmem:[#allocation12_spill] sm:$0xff] }
  0x5a   : > { %884 = vmatpush.msra.mxu0 %v5939_v11  ;;  %987 = vmatpush.msra.mxu2 %v5947_v21  ;;  %v5951_v37 = vand.u32 4294901760, %v5950_v38  ;;  %v4074_v21 = vand.u32 4294901760, %v333_v53 }
  0x5b   : > { %875 = vmatmul.f32.vlgmr.msrb.gmra.mxu3 %v3847_v57  ;;  %938 = vmatpush.msra.mxu1 %v3513_v45  ;;  %v5952_v45 = vand.u32 4294901760, %v3627_v39 }
  0x5c   : > { %887 = vmatpush.msra.mxu0 %v5944_v50  ;;  %991 = vmatpush.msra.mxu2 %v5949_v19 }
  0x5d   : > { %1048 = vmatpush.msra.mxu3 %v3539_v7  ;;  %733 = vmatmul.f32.vlgmr.msrb.gmra.mxu1 %v3844_v29 }
  0x5e   : > { %890 = vmatpush.msra.mxu0 %v5946_v1  ;;  %940 = vmatpush.msra.mxu1 %v3539_v7  ;;  %v5953_v7 = vand.u32 4294901760, %v3644_v62 }
  0x5f   : > { %696 = vmatmul.f32.vlgmr.msrb.gmra.mxu0 %v3844_v29  ;;  %995 = vmatpush.msra.mxu2 %v5951_v37  ;;  %v329_v37 = vld [vmem:[%s5782_s1 + $0x230] sm:$0xff] }
  0x60   : > { %893 = vmatpush.msra.mxu0 %v5948_v30  ;;  %1050 = vmatpush.msra.mxu3 %v3552_v2 }
  0x61   : > { %942 = vmatpush.msra.mxu1 %v3552_v2  ;;  %999 = vmatpush.msra.mxu2 %v5952_v45  ;;  %v5954_v2 = vand.u32 4294901760, %v3670_v59 }
  0x62   : > { %896 = vmatpush.msra.mxu0 %v5950_v38  ;;  %1052 = vmatpush.msra.mxu3 %v3568_v47 }
  0x63   : > { %944 = vmatpush.msra.mxu1 %v3568_v47  ;;  %1003 = vmatpush.msra.mxu2 %v5953_v7  ;;  %v5955_v47 = vand.u32 4294901760, %v3697_v51 }
  0x64   : > { %899 = vmatpush.msra.mxu0 %v3627_v39  ;;  %1054 = vmatpush.msra.mxu3 %v3586_v24  ;;  %v3934_v39 = vand.u32 4294901760, %v353_v27 }
  0x65   : > { %946 = vmatpush.msra.mxu1 %v3586_v24  ;;  %1007 = vmatpush.msra.mxu2 %v5954_v2  ;;  %v351_v24 = vld [vmem:[%s5782_s1 + $0x2e0] sm:$0xff] }
  0x66   : > { %902 = vmatpush.msra.mxu0 %v3644_v62  ;;  %1056 = vmatpush.msra.mxu3 %v3601_v25  ;;  %v5956_v62 = vand.u32 4294901760, %v3719_v42  ;;  %v3944_v48 = vand.u32 4294901760, %v351_v24 }
  0x67   : > { %948 = vmatpush.msra.mxu1 %v3601_v25  ;;  %1011 = vmatpush.msra.mxu2 %v5955_v47  ;;  %v349_v25 = vld [vmem:[%s5782_s1 + $0x2d0] sm:$0xff] }
  0x68   : > { %905 = vmatpush.msra.mxu0 %v3670_v59  ;;  %1058 = vmatpush.msra.mxu3 %v3636_v54  ;;  %v3954_v59 = vand.u32 4294901760, %v349_v25 }
  0x69   : > { %950 = vmatpush.msra.mxu1 %v3636_v54  ;;  %1015 = vmatpush.msra.mxu2 %v5956_v62  ;;  %v347_v54 = vld [vmem:[%s5782_s1 + $0x2c0] sm:$0xff]  ;;  %v390_v62 = vperm.slane %v3836_v8, 2 }
  0x6a   : > { %908 = vmatpush.msra.mxu0 %v3697_v51  ;;  %1060 = vmatpush.msra.mxu3 %v3658_v56  ;;  %v3957_v51 = vsub.f32 %v353_v27, %v3934_v39 }
  0x6b   : > { %952 = vmatpush.msra.mxu1 %v3658_v56  ;;  %1019 = vmatpush.msra.mxu2 %v846_v55  ;;  %v345_v56 = vld [vmem:[%s5782_s1 + $0x2b0] sm:$0xff]  ;;  %v3970_v55 = vsub.f32 %v351_v24, %v3944_v48  ;;  %v327_v24 = vld [vmem:[%s5782_s1 + $0x220] sm:$0xff] }
  0x6c   : > { %911 = vmatpush.msra.mxu0 %v3719_v42  ;;  %1062 = vmatpush.msra.mxu3 %v3688_v33  ;;  %v3967_v42 = vand.u32 4294901760, %v347_v54 }
  0x6d   : > { %954 = vmatpush.msra.mxu1 %v3688_v33  ;;  %1023 = vmatpush.msra.mxu2 %v852_v0  ;;  %v3978_v33 = vand.u32 4294901760, %v345_v56  ;;  %v3984_v0 = vsub.f32 %v349_v25, %v3954_v59 }
  0x6e   : > { %914 = vmatpush.msra.mxu0 %v3733_v13  ;;  %1064 = vmatpush.msra.mxu3 %v3702_v6  ;;  %v5831_v13 = vand.u32 4294901760, %v3957_v51  ;;  %v3998_v52 = vsub.f32 %v347_v54, %v3967_v42  ;;  %v4105_v54 = vand.u32 4294901760, %v329_v37 }
  0x6f   : > { %956 = vmatpush.msra.mxu1 %v3702_v6  ;;  %1027 = vmatpush.msra.mxu2 %v858_v61  ;;  %v3989_v6 = vand.u32 4294901760, %v343_v40  ;;  %v341_v61 = vld [vmem:[%s5782_s1 + $0x290] sm:$0xff]  ;;  %v5969_v26 = vand.u32 4294901760, %v3984_v0 }
  0x70   : > { %917 = vmatpush.msra.mxu0 %v3754_v41  ;;  %1066 = vmatpush.msra.mxu3 %v3727_v12  ;;  %v5830_v41 = vand.u32 4294901760, %v3970_v55  ;;  %v4014_v15 = vand.u32 4294901760, %v341_v61  ;;  %v5827_v4 = vand.u32 4294901760, %v3998_v52 }
  0x71   : > { %958 = vmatpush.msra.mxu1 %v3727_v12  ;;  %1031 = vmatpush.msra.mxu2 %v864_v63  ;;  %v4004_v12 = vsub.f32 %v345_v56, %v3978_v33  ;;  %v339_v63 = vld [vmem:[%s5782_s1 + $0x280] sm:$0xff] }
  0x72   : > { %920 = vmatpush.msra.mxu0 %v3771_v35  ;;  %1068 = vmatpush.msra.mxu3 %v3742_v16  ;;  %v1122_v35 = vsub.f32 %v3957_v51, %v5831_v13  ;;  %v1128_v3 = vsub.f32 %v3970_v55, %v5830_v41  ;;  %v4030_v46 = vand.u32 4294901760, %v339_v63  ;;  %v4047_v14 = vsub.f32 %v341_v61, %v4014_v15 }
  0x73   : > { %960 = vmatpush.msra.mxu1 %v3742_v16  ;;  %1035 = vmatpush.msra.mxu2 %v870_v23  ;;  %v5829_v16 = vand.u32 4294901760, %v3984_v0  ;;  %v4020_v23 = vsub.f32 %v343_v40, %v3989_v6  ;;  %v1140_v31 = vsub.f32 %v3998_v52, %v5827_v4  ;;  %v4109_v40 = vsub.f32 %v333_v53, %v4074_v21 }
  0x74   : > { %923 = vmatpush.msra.mxu0 %v3785_v5  ;;  %1070 = vmatpush.msra.mxu3 %v3756_v20  ;;  %v337_v5 = vld [vmem:[%s5782_s1 + $0x270] sm:$0xff]  ;;  %v1123_v49 = vand.u32 4294901760, %v1122_v35  ;;  %v1129_v11 = vand.u32 4294901760, %v1128_v3  ;;  %v4063_v50 = vsub.f32 %v339_v63, %v4030_v46  ;;  %v5823_v30 = vand.u32 4294901760, %v4047_v14 }
  0x75   : > { %1037 = vmatmul.f32.vlgmr.msra.gmra.mxu2 %v3847_v57  ;;  %962 = vmatpush.msra.mxu1 %v3756_v20  ;;  %v5826_v20 = vand.u32 4294901760, %v4004_v12  ;;  %v1134_v43 = vsub.f32 %v3984_v0, %v5829_v16  ;;  %v4044_v10 = vand.u32 4294901760, %v337_v5  ;;  %v5824_v32 = vand.u32 4294901760, %v4020_v23 }
  0x76   : > { %926 = vmatpush.msra.mxu0 %v3798_v22  ;;  %1222 = vmatpush.msrb.mxu2 %v3957_v51  ;;  %v335_v22 = vld [vmem:[%s5782_s1 + $0x260] sm:$0xff]  ;;  %v1141_v45 = vand.u32 4294901760, %v1140_v31  ;;  %v5822_v2 = vand.u32 4294901760, %v4063_v50  ;;  %v1158_v25 = vsub.f32 %v4047_v14, %v5823_v30  ;;  %v4117_v35 = vand.u32 4294901760, %v327_v24  ;;  %v381_v30 = vld [vmem:[%s5782_s1 + $0x3d0] sm:$0xff] }
  0x77   : > { %929 = vmatmul.f32.vlgmr.msra.gmra.mxu0 %v3855_v58  ;;  %1072 = vmatpush.msra.mxu3 %v3773_v9  ;;  %v4060_v60 = vand.u32 4294901760, %v335_v22  ;;  %v1146_v28 = vsub.f32 %v4004_v12, %v5826_v20  ;;  %v1135_v1 = vand.u32 4294901760, %v1134_v43  ;;  %v4078_v19 = vsub.f32 %v337_v5, %v4044_v10  ;;  %v379_v20 = vld [vmem:[%s5782_s1 + $0x3c0] sm:$0xff] }
  0x78   : > { %1079 = vmatpush.msrb.mxu0 %v3934_v39  ;;  %1074 = vmatmul.f32.vlgmr.msra.gmra.mxu3 %v3847_v57  ;;  %v1152_v38 = vsub.f32 %v4020_v23, %v5824_v32  ;;  %v1164_v63 = vsub.f32 %v4063_v50, %v5822_v2  ;;  %v1159_v43 = vand.u32 4294901760, %v1158_v25  ;;  %v4136_v31 = vsub.f32 %v329_v37, %v4105_v54  ;;  %v323_v37 = vld [vmem:[%s5782_s1 + $0x200] sm:$0xff] }
  0x79   : > { %1225 = vmatpush.msrb.mxu2 %v3970_v55  ;;  %1275 = vmatpush.msrb.mxu3 %v3934_v39  ;;  %v4093_v27 = vsub.f32 %v335_v22, %v4060_v60  ;;  %v1147_v47 = vand.u32 4294901760, %v1146_v28  ;;  %v5820_v56 = vand.u32 4294901760, %v4078_v19  ;;  %v325_v22 = vld [vmem:[%s5782_s1 + $0x210] sm:$0xff]  ;;  %v4225_v13 = vand.u32 4294901760, %v379_v20 }
  0x7a   : > { %1081 = vmatpush.msrb.mxu0 %v3944_v48  ;;  %964 = vmatpush.msra.mxu1 %v3773_v9  ;;  %v331_v9 = vld [vmem:[%s5782_s1 + $0x240] sm:$0xff]  ;;  %v1153_v61 = vand.u32 4294901760, %v1152_v38  ;;  %v4140_v28 = vand.u32 4294901760, %v325_v22 }
  0x7b   : > { %968 = vmatmul.f32.vlgmr.msra.gmra.mxu1 %v3863_v44  ;;  %1228 = vmatpush.msrb.mxu2 %v3984_v0  ;;  %v4089_v7 = vand.u32 4294901760, %v331_v9  ;;  %v5819_v5 = vand.u32 4294901760, %v4093_v27  ;;  %v1170_v53 = vsub.f32 %v4078_v19, %v5820_v56 }
  0x7c   : > { %1083 = vmatpush.msrb.mxu0 %v3954_v59  ;;  %1124 = vmatpush.msrb.mxu1 %v1123_v49  ;;  %v4128_v49 = vand.u32 4294901760, %v390_v62 }
  0x7d   : > { %1277 = vmatpush.msrb.mxu3 %v3944_v48  ;;  %1231 = vmatpush.msrb.mxu2 %v3998_v52  ;;  %v4121_v3 = vsub.f32 %v331_v9, %v4089_v7  ;;  %v385_v9 = vld [vmem:[%s5782_s1 + $0x3f0] sm:$0xff]  ;;  %v1176_v38 = vsub.f32 %v4093_v27, %v5819_v5  ;;  %v5828_v5 = vand.u32 4294901760, %v4136_v31 }
  0x7e   : > { %1085 = vmatpush.msrb.mxu0 %v3967_v42  ;;  %1130 = vmatpush.msrb.mxu1 %v1129_v11  ;;  %v5821_v11 = vand.u32 4294901760, %v4109_v40  ;;  %v4159_v25 = vsub.f32 %v390_v62, %v4128_v49  ;;  %v4166_v56 = vand.u32 4294901760, %v385_v9  ;;  %v4173_v62 = vand.u32 4294901760, %v323_v37 }
  0x7f   : > { %1279 = vmatpush.msrb.mxu3 %v3954_v59  ;;  %1234 = vmatpush.msrb.mxu2 %v4004_v12 }
  0x80   : > { %1087 = vmatpush.msrb.mxu0 %v3978_v33  ;;  %1136 = vmatpush.msrb.mxu1 %v1135_v1  ;;  %v1165_v1 = vand.u32 4294901760, %v1164_v63  ;;  %5957 = vst [vmem:[#allocation8_spill] sm:$0xff] %v4159_v25  ;;  %v1182_v63 = vsub.f32 %v4109_v40, %v5821_v11  ;;  %v4206_v4 = vsub.f32 %v323_v37, %v4173_v62 }
  0x81   : > { %1281 = vmatpush.msrb.mxu3 %v3967_v42  ;;  %1237 = vmatpush.msrb.mxu2 %v4020_v23 }
  0x82   : > { %1089 = vmatpush.msrb.mxu0 %v3989_v6  ;;  %1142 = vmatpush.msrb.mxu1 %v1141_v45  ;;  %v5825_v45 = vand.u32 4294901760, %v4121_v3 }
  0x83   : > { %1283 = vmatpush.msrb.mxu3 %v3978_v33  ;;  %1240 = vmatpush.msrb.mxu2 %v4047_v14 }
  0x84   : > { %1091 = vmatpush.msrb.mxu0 %v4014_v15  ;;  %1148 = vmatpush.msrb.mxu1 %v1147_v47  ;;  %v4154_v47 = vsub.f32 %v327_v24, %v4117_v35  ;;  %v383_v24 = vld [vmem:[%s5782_s1 + $0x3e0] sm:$0xff]  ;;  %v1188_v11 = vsub.f32 %v4121_v3, %v5825_v45  ;;  %v4198_v45 = vsub.f32 %v385_v9, %v4166_v56  ;;  %v377_v9 = vld [vmem:[%s5782_s1 + $0x3b0] sm:$0xff] }
  0x85   : > { %1285 = vmatpush.msrb.mxu3 %v3989_v6  ;;  %1243 = vmatpush.msrb.mxu2 %v4063_v50  ;;  %v4191_v32 = vand.u32 4294901760, %v383_v24 }
  0x86   : > { %1093 = vmatpush.msrb.mxu0 %v4030_v46  ;;  %1154 = vmatpush.msrb.mxu1 %v1153_v61  ;;  %v1171_v61 = vand.u32 4294901760, %v1170_v53  ;;  %v1177_v53 = vand.u32 4294901760, %v1176_v38  ;;  %v5832_v2 = vand.u32 4294901760, %v4154_v47  ;;  %v1194_v38 = vsub.f32 %v4136_v31, %v5828_v5 }
  0x87   : > { %1287 = vmatpush.msrb.mxu3 %v4014_v15  ;;  %1246 = vmatpush.msrb.mxu2 %v4078_v19  ;;  %5959 = vst [vmem:[#allocation9_spill] sm:$0xff] %v4191_v32  ;;  %v1189_v5 = vand.u32 4294901760, %v1188_v11  ;;  %v4223_v41 = vsub.f32 %v383_v24, %v4191_v32  ;;  %v375_v11 = vld [vmem:[%s5782_s1 + $0x3a0] sm:$0xff] }
  0x88   : > { %1095 = vmatpush.msrb.mxu0 %v4044_v10  ;;  %1160 = vmatpush.msrb.mxu1 %v1159_v43  ;;  %v4176_v43 = vsub.f32 %v325_v22, %v4140_v28  ;;  %v4189_v22 = vand.u32 4294901760, %v4159_v25  ;;  %v1200_v16 = vsub.f32 %v4154_v47, %v5832_v2  ;;  %v373_v2 = vld [vmem:[%s5782_s1 + $0x390] sm:$0xff] }
  0x89   : > { %1289 = vmatpush.msrb.mxu3 %v4030_v46  ;;  %1249 = vmatpush.msrb.mxu2 %v4093_v27  ;;  %v4273_v29 = vand.u32 4294901760, %v373_v2 }
  0x8a   : > { %1097 = vmatpush.msrb.mxu0 %v4060_v60  ;;  %1166 = vmatpush.msrb.mxu1 %v1165_v1  ;;  %5958 = vst [vmem:[#allocation6_spill] sm:$0xff] %v4189_v22  ;;  %v1183_v1 = vand.u32 4294901760, %v1182_v63  ;;  %v4209_v63 = vand.u32 4294901760, %v381_v30  ;;  %v1113_v37 = vsub.f32 %v4159_v25, %v4189_v22  ;;  %v5960_v24 = vand.u32 4294901760, %v4176_v43 }
  0x8b   : > { %1291 = vmatpush.msrb.mxu3 %v4044_v10  ;;  %1252 = vmatpush.msrb.mxu2 %v4109_v40 }
  0x8c   : > { %1099 = vmatpush.msrb.mxu0 %v4074_v21  ;;  %1172 = vmatpush.msrb.mxu1 %v1171_v61  ;;  %v4232_v61 = vand.u32 4294901760, %v377_v9  ;;  %v1206_v36 = vsub.f32 %v4176_v43, %v5960_v24  ;;  %v4241_v58 = vsub.f32 %v381_v30, %v4209_v63  ;;  %v4250_v57 = vand.u32 4294901760, %v1113_v37  ;;  %v371_v37 = vld [vmem:[%s5782_s1 + $0x380] sm:$0xff] }
  0x8d   : > { %1293 = vmatpush.msrb.mxu3 %v4060_v60  ;;  %1255 = vmatpush.msrb.mxu2 %v4121_v3  ;;  %v4255_v30 = vsub.f32 %v379_v20, %v4225_v13  ;;  %v5963_v24 = vand.u32 4294901760, %v4206_v4  ;;  %v4288_v18 = vand.u32 4294901760, %v371_v37 }
  0x8e   : > { %1101 = vmatpush.msrb.mxu0 %v4089_v7  ;;  %1178 = vmatpush.msrb.mxu1 %v1177_v53  ;;  %v1195_v53 = vand.u32 4294901760, %v1194_v38  ;;  %v4244_v38 = vand.u32 4294901760, %v375_v11  ;;  %5961 = vst [vmem:[#allocation10_spill] sm:$0xff] %v4250_v57  ;;  %v4262_v44 = vsub.f32 %v377_v9, %v4232_v61  ;;  %v1207_v20 = vand.u32 4294901760, %v1206_v36 }
  0x8f   : > { %1295 = vmatpush.msrb.mxu3 %v4074_v21  ;;  %1258 = vmatpush.msrb.mxu2 %v4136_v31  ;;  %v5964_v36 = vand.u32 4294901760, %v4223_v41  ;;  %v5966_v17 = vand.u32 4294901760, %v4241_v58 }
  0x90   : > { %1103 = vmatpush.msrb.mxu0 %v4105_v54  ;;  %1184 = vmatpush.msrb.mxu1 %v1183_v1  ;;  %v1201_v1 = vand.u32 4294901760, %v1200_v16  ;;  %v5962_v16 = vand.u32 4294901760, %v4198_v45  ;;  %v4277_v9 = vsub.f32 %v375_v11, %v4244_v38 }
  0x91   : > { %1297 = vmatpush.msrb.mxu3 %v4089_v7  ;;  %1261 = vmatpush.msrb.mxu2 %v4154_v47  ;;  %v1475_v34 = vsub.f32 %v4241_v58, %v5966_v17 }
  0x92   : > { %1105 = vmatpush.msrb.mxu0 %v4117_v35  ;;  %1190 = vmatpush.msrb.mxu1 %v1189_v5  ;;  %v1463_v5 = vsub.f32 %v4198_v45, %v5962_v16  ;;  %v369_v16 = vld [vmem:[%s5782_s1 + $0x370] sm:$0xff] }
  0x93   : > { %1299 = vmatpush.msrb.mxu3 %v4105_v54  ;;  %1264 = vmatpush.msrb.mxu2 %v4176_v43 }
  0x94   : > { %1107 = vmatpush.msrb.mxu0 %v4140_v28  ;;  %1196 = vmatpush.msrb.mxu1 %v1195_v53  ;;  %v1212_v53 = vsub.f32 %v4206_v4, %v5963_v24  ;;  %v1469_v24 = vsub.f32 %v4223_v41, %v5964_v36  ;;  %v1464_v11 = vand.u32 4294901760, %v1463_v5  ;;  %v5967_v5 = vand.u32 4294901760, %v3970_v55 }
  0x95   : > { %1301 = vmatpush.msrb.mxu3 %v4117_v35  ;;  %1267 = vmatpush.msrb.mxu2 %v4206_v4  ;;  %v4319_v55 = vsub.f32 %v371_v37, %v4288_v18 }
  0x96   : > { %1109 = vmatpush.msrb.mxu0 %v4173_v62  ;;  %1202 = vmatpush.msrb.mxu1 %v1201_v1  ;;  %v5965_v1 = vand.u32 4294901760, %v3957_v51  ;;  %v1213_v36 = vand.u32 4294901760, %v1212_v53  ;;  %v4302_v51 = vsub.f32 %v373_v2, %v4273_v29  ;;  %v1470_v17 = vand.u32 4294901760, %v1469_v24  ;;  %v363_v24 = vld [vmem:[%s5782_s1 + $0x340] sm:$0xff] }
  0x97   : > { %1115 = vmatmul.f32.vlgmr.msrb.gmra.mxu0 %v4250_v57  ;;  %1303 = vmatpush.msrb.mxu3 %v4140_v28  ;;  %v367_v57 = vld [vmem:[%s5782_s1 + $0x360] sm:$0xff]  ;;  %v5968_v2 = vand.u32 4294901760, %v4255_v30 }
  0x98   : > { %1316 = vmatpush.msra.mxu0 %v5965_v1  ;;  %1270 = vmatmul.f32.vlgmr.msrb.gmra.mxu2 %v4159_v25  ;;  %v4304_v1 = vand.u32 4294901760, %v369_v16  ;;  %v5970_v25 = vand.u32 4294901760, %v4262_v44 }
  0x99   : > { %1420 = vmatpush.msra.mxu2 %v4166_v56  ;;  %1208 = vmatpush.msrb.mxu1 %v1207_v20  ;;  %v365_v20 = vld [vmem:[%s5782_s1 + $0x350] sm:$0xff]  ;;  %v1481_v53 = vsub.f32 %v4255_v30, %v5968_v2  ;;  %v1476_v2 = vand.u32 4294901760, %v1475_v34 }
  0x9a   : > { %1320 = vmatpush.msra.mxu0 %v5967_v5  ;;  %1305 = vmatpush.msrb.mxu3 %v4173_v62  ;;  %v4321_v5 = vand.u32 4294901760, %v367_v57  ;;  %v4336_v0 = vand.u32 4294901760, %v365_v20  ;;  %v361_v34 = vld [vmem:[%s5782_s1 + $0x330] sm:$0xff] }
  0x9b   : > { %1309 = vmatmul.f32.vlgmr.msrb.gmra.mxu3 %v4189_v22  ;;  %1422 = vmatpush.msra.mxu2 %v4191_v32  ;;  %v1487_v22 = vsub.f32 %v4262_v44, %v5970_v25  ;;  %v4334_v32 = vsub.f32 %v369_v16, %v4304_v1  ;;  %v5972_v25 = vand.u32 4294901760, %v4277_v9  ;;  %v1482_v16 = vand.u32 4294901760, %v1481_v53 }
  0x9c   : > { %1324 = vmatpush.msra.mxu0 %v5969_v26  ;;  %1465 = vmatpush.msra.mxu3 %v1464_v11  ;;  %v5971_v26 = vand.u32 4294901760, %v3998_v52  ;;  %v4350_v37 = vsub.f32 %v367_v57, %v4321_v5  ;;  %v4352_v52 = vand.u32 4294901760, %v363_v24  ;;  %v4363_v57 = vsub.f32 %v365_v20, %v4336_v0 }
  0x9d   : > { %1214 = vmatpush.msrb.mxu1 %v1213_v36  ;;  %1424 = vmatpush.msra.mxu2 %v4209_v63  ;;  %v1493_v11 = vsub.f32 %v4277_v9, %v5972_v25  ;;  %v1488_v25 = vand.u32 4294901760, %v1487_v22  ;;  %v5849_v53 = vand.u32 4294901760, %v4334_v32  ;;  %v4365_v36 = vand.u32 4294901760, %v361_v34 }
  0x9e   : > { %1328 = vmatpush.msra.mxu0 %v5971_v26  ;;  %1216 = vmatmul.f32.vlgmr.msrb.gmra.mxu1 %v4128_v49  ;;  %v5973_v26 = vand.u32 4294901760, %v4004_v12  ;;  %v359_v12 = vld [vmem:[%s5782_s1 + $0x320] sm:$0xff]  ;;  %v5975_v22 = vand.u32 4294901760, %v4020_v23  ;;  %v357_v23 = vld [vmem:[%s5782_s1 + $0x310] sm:$0xff] }
  0x9f   : > { %1383 = vmatpush.msra.mxu1 %v3934_v39  ;;  %1471 = vmatpush.msra.mxu3 %v1470_v17  ;;  %v5974_v39 = vand.u32 4294901760, %v4302_v51 }
  0xa0   : > { %1332 = vmatpush.msra.mxu0 %v5973_v26  ;;  %1426 = vmatpush.msra.mxu2 %v4225_v13  ;;  %v4396_v26 = vsub.f32 %v361_v34, %v4365_v36 }
  0xa1   : > { %1385 = vmatpush.msra.mxu1 %v3944_v48  ;;  %1477 = vmatpush.msra.mxu3 %v1476_v2  ;;  %v1499_v17 = vsub.f32 %v4302_v51, %v5974_v39  ;;  %v1494_v48 = vand.u32 4294901760, %v1493_v11  ;;  %v5976_v2 = vand.u32 4294901760, %v4319_v55  ;;  %v4379_v39 = vsub.f32 %v363_v24, %v4352_v52 }
  0xa2   : > { %1336 = vmatpush.msra.mxu0 %v5975_v22  ;;  %1428 = vmatpush.msra.mxu2 %v4232_v61  ;;  %v391_v22 = vperm.slane %v3836_v8, 3  ;;  %v5977_v11 = vand.u32 4294901760, %v4047_v14  ;;  %v1511_v24 = vsub.f32 %v4334_v32, %v5849_v53  ;;  %v5978_v8 = vand.u32 4294901760, %v4063_v50 }
  0xa3   : > { %1387 = vmatpush.msra.mxu1 %v3954_v59  ;;  %1483 = vmatpush.msra.mxu3 %v1482_v16  ;;  %v1505_v20 = vsub.f32 %v4319_v55, %v5976_v2  ;;  %v4388_v59 = vand.u32 4294901760, %v359_v12  ;;  %v1500_v16 = vand.u32 4294901760, %v1499_v17  ;;  %v1522_v2 = vand.u32 4294901760, %v4363_v57 }
  0xa4   : > { %1340 = vmatpush.msra.mxu0 %v5977_v11  ;;  %1430 = vmatpush.msra.mxu2 %v4244_v38  ;;  %v4401_v14 = vand.u32 4294901760, %v357_v23  ;;  %v5979_v17 = vand.u32 4294901760, %v4350_v37  ;;  %v1528_v11 = vand.u32 4294901760, %v4379_v39  ;;  %v4411_v50 = vand.u32 4294901760, %v391_v22 }
  0xa5   : > { %1389 = vmatpush.msra.mxu1 %v3967_v42  ;;  %1489 = vmatpush.msra.mxu3 %v1488_v25  ;;  %v355_v42 = vld [vmem:[%s5782_s1 + $0x300] sm:$0xff]  ;;  %v1506_v25 = vand.u32 4294901760, %v1505_v20  ;;  %v4417_v53 = vsub.f32 %v359_v12, %v4388_v59  ;;  %v1534_v20 = vand.u32 4294901760, %v4396_v26 }
  0xa6   : > { %1344 = vmatpush.msra.mxu0 %v5978_v8  ;;  %1432 = vmatpush.msra.mxu2 %v4273_v29  ;;  %v1517_v34 = vsub.f32 %v4350_v37, %v5979_v17  ;;  %5980 = vst [vmem:[#allocation11_spill] sm:$0xff] %v4411_v50  ;;  %v5981_v8 = vand.u32 4294901760, %v4078_v19  ;;  %v4424_v17 = vand.u32 4294901760, %v355_v42  ;;  %v5982_v19 = vand.u32 4294901760, %v4093_v27 }
  0xa7   : > { %1391 = vmatpush.msra.mxu1 %v3978_v33  ;;  %1495 = vmatpush.msra.mxu3 %v1494_v48  ;;  %v1512_v33 = vand.u32 4294901760, %v1511_v24  ;;  %v1523_v48 = vsub.f32 %v4363_v57, %v1522_v2  ;;  %v4430_v12 = vsub.f32 %v357_v23, %v4401_v14  ;;  %v4437_v24 = vsub.f32 %v391_v22, %v4411_v50 }
  0xa8   : > { %1348 = vmatpush.msra.mxu0 %v5981_v8  ;;  %1434 = vmatpush.msra.mxu2 %v4288_v18  ;;  %v5984_v8 = vand.u32 4294901760, %v4109_v40  ;;  %v1540_v27 = vand.u32 4294901760, %v4417_v53  ;;  %v1535_v23 = vsub.f32 %v4396_v26, %v1534_v20  ;;  %v5985_v22 = vand.u32 4294901760, %v4121_v3 }
  0xa9   : > { %1393 = vmatpush.msra.mxu1 %v3989_v6  ;;  %1501 = vmatpush.msra.mxu3 %v1500_v16  ;;  %v1518_v6 = vand.u32 4294901760, %v1517_v34  ;;  %v1529_v16 = vsub.f32 %v4379_v39, %v1528_v11  ;;  %5983 = vst [vmem:[#allocation12_spill] sm:$0xff] %v4437_v24  ;;  %v1546_v40 = vand.u32 4294901760, %v4430_v12  ;;  %v4456_v34 = vand.u32 4294901760, %v4437_v24 }
  0xaa   : > { %1352 = vmatpush.msra.mxu0 %v5982_v19  ;;  %1436 = vmatpush.msra.mxu2 %v4304_v1  ;;  %v1541_v3 = vsub.f32 %v4417_v53, %v1540_v27 }
  0xab   : > { %1395 = vmatpush.msra.mxu1 %v4014_v15  ;;  %1507 = vmatpush.msra.mxu3 %v1506_v25  ;;  %v1524_v15 = vand.u32 4294901760, %v1523_v48  ;;  %v4448_v25 = vsub.f32 %v355_v42, %v4424_v17  ;;  %5986 = vst [vmem:[#allocation18_spill] sm:$0xff] %v4456_v34  ;;  %v1536_v42 = vand.u32 4294901760, %v1535_v23  ;;  %v5988_v48 = vand.u32 4294901760, %v4154_v47 }
  0xac   : > { %1356 = vmatpush.msra.mxu0 %v5984_v8  ;;  %1438 = vmatpush.msra.mxu2 %v4321_v5  ;;  %v1454_v19 = vsub.f32 %v4437_v24, %v4456_v34 }
  0xad   : > { %1397 = vmatpush.msra.mxu1 %v4030_v46  ;;  %1513 = vmatpush.msra.mxu3 %v1512_v33  ;;  %v1530_v46 = vand.u32 4294901760, %v1529_v16  ;;  %v5987_v33 = vand.u32 4294901760, %v4136_v31  ;;  %v1547_v31 = vsub.f32 %v4430_v12, %v1546_v40  ;;  %v5990_v16 = vand.u32 4294901760, %v4206_v4 }
  0xae   : > { %1360 = vmatpush.msra.mxu0 %v5985_v22  ;;  %1440 = vmatpush.msra.mxu2 %v4336_v0  ;;  %v5991_v4 = vand.u32 4294901760, %v4198_v45  ;;  %v272_v22 = vld [vmem:[%s5782_s1 + $0x68] sm:$0xff] }
  0xaf   : > { %1399 = vmatpush.msra.mxu1 %v4044_v10  ;;  %1519 = vmatpush.msra.mxu3 %v1518_v6  ;;  %v1552_v10 = vand.u32 4294901760, %v4448_v25  ;;  %v1542_v6 = vand.u32 4294901760, %v1541_v3 }
  0xb0   : > { %1364 = vmatpush.msra.mxu0 %v5987_v33  ;;  %1442 = vmatpush.msra.mxu2 %v4352_v52 }
  0xb1   : > { %1401 = vmatpush.msra.mxu1 %v4060_v60  ;;  %1525 = vmatpush.msra.mxu3 %v1524_v15  ;;  %v5989_v60 = vand.u32 4294901760, %v4176_v43  ;;  %v1553_v47 = vsub.f32 %v4448_v25, %v1552_v10  ;;  %v4487_v43 = vand.u32 4294901760, %v1454_v19 }
  0xb2   : > { %1368 = vmatpush.msra.mxu0 %v5988_v48  ;;  %1444 = vmatpush.msra.mxu2 %v4365_v36 }
  0xb3   : > { %1403 = vmatpush.msra.mxu1 %v4074_v21  ;;  %1531 = vmatpush.msra.mxu3 %v1530_v46  ;;  %v1548_v21 = vand.u32 4294901760, %v1547_v31  ;;  %v4678_v31 = vand.u32 4294901760, %v272_v22 }
  0xb4   : > { %1372 = vmatpush.msra.mxu0 %v5989_v60  ;;  %1446 = vmatpush.msra.mxu2 %v4388_v59 }
  0xb5   : > { %1405 = vmatpush.msra.mxu1 %v4089_v7  ;;  %1537 = vmatpush.msra.mxu3 %v1536_v42  ;;  %v1554_v7 = vand.u32 4294901760, %v1553_v47  ;;  %v270_v42 = vld [vmem:[%s5782_s1 + $0x58] sm:$0xff] }
  0xb6   : > { %1376 = vmatpush.msra.mxu0 %v5990_v16  ;;  %1448 = vmatpush.msra.mxu2 %v4401_v14  ;;  %v4691_v16 = vand.u32 4294901760, %v270_v42 }
  0xb7   : > { %1378 = vmatmul.f32.vlgmr.msra.gmra.mxu0 %v4128_v49  ;;  %1407 = vmatpush.msra.mxu1 %v4105_v54  ;;  %v5992_v54 = vand.u32 4294901760, %v4223_v41 }
  0xb8   : > { %1563 = vmatpush.msrb.mxu0 %v4198_v45  ;;  %1543 = vmatpush.msra.mxu3 %v1542_v6  ;;  %v5998_v45 = vand.u32 4294901760, %v4302_v51  ;;  %v268_v6 = vld [vmem:[%s5782_s1 + $0x48] sm:$0xff] }
  0xb9   : > { %1409 = vmatpush.msra.mxu1 %v4117_v35  ;;  %1450 = vmatpush.msra.mxu2 %v4424_v17  ;;  %v5993_v35 = vand.u32 4294901760, %v4241_v58 }
  0xba   : > { %1566 = vmatpush.msrb.mxu0 %v4223_v41  ;;  %1549 = vmatpush.msra.mxu3 %v1548_v21  ;;  %v5995_v41 = vand.u32 4294901760, %v4255_v30 }
  0xbb   : > { %1456 = vmatmul.f32.vlgmr.msra.gmra.mxu2 %v4487_v43  ;;  %1411 = vmatpush.msra.mxu1 %v4140_v28  ;;  %v5994_v28 = vld [vmem:[#allocation9_spill] sm:$0xff] }
  0xbc   : > { %1569 = vmatpush.msrb.mxu0 %v4241_v58  ;;  %1657 = vmatpush.msrb.mxu2 %v5991_v4  ;;  %v5997_v58 = vand.u32 4294901760, %v4277_v9  ;;  %v266_v4 = vld [vmem:[%s5782_s1 + $0x38] sm:$0xff] }
  0xbd   : > { %1555 = vmatpush.msra.mxu3 %v1554_v7  ;;  %1413 = vmatpush.msra.mxu1 %v4173_v62  ;;  %v6000_v62 = vand.u32 4294901760, %v4334_v32 }
  0xbe   : > { %1557 = vmatmul.f32.vlgmr.msra.gmra.mxu3 %v4411_v50  ;;  %1572 = vmatpush.msrb.mxu0 %v4255_v30 }
  0xbf   : > { %1661 = vmatpush.msrb.mxu2 %v5992_v54  ;;  %1724 = vmatpush.msrb.mxu3 %v4166_v56 }
  0xc0   : > { %1415 = vmatmul.f32.vlgmr.msra.gmra.mxu1 %v4128_v49  ;;  %1575 = vmatpush.msrb.mxu0 %v4262_v44 }
  0xc1   : > { %1616 = vmatpush.msrb.mxu1 %v4166_v56  ;;  %1665 = vmatpush.msrb.mxu2 %v5993_v35  ;;  %v5996_v56 = vand.u32 4294901760, %v4262_v44  ;;  %v5999_v44 = vand.u32 4294901760, %v4319_v55 }
  0xc2   : > { %1726 = vmatpush.msrb.mxu3 %v5994_v28  ;;  %1578 = vmatpush.msrb.mxu0 %v4277_v9 }
  0xc3   : > { %1618 = vmatpush.msrb.mxu1 %v5994_v28  ;;  %1669 = vmatpush.msrb.mxu2 %v5995_v41  ;;  %v4706_v28 = vand.u32 4294901760, %v268_v6  ;;  %v4709_v41 = vsub.f32 %v272_v22, %v4678_v31 }
  0xc4   : > { %1728 = vmatpush.msrb.mxu3 %v4209_v63  ;;  %1581 = vmatpush.msrb.mxu0 %v4302_v51  ;;  %v282_v51 = vld [vmem:[%s5782_s1 + $0xb8] sm:$0xff] }
  0xc5   : > { %1620 = vmatpush.msrb.mxu1 %v4209_v63  ;;  %1673 = vmatpush.msrb.mxu2 %v5996_v56  ;;  %v6001_v63 = vand.u32 4294901760, %v4350_v37 }
  0xc6   : > { %1730 = vmatpush.msrb.mxu3 %v4225_v13  ;;  %1584 = vmatpush.msrb.mxu0 %v4319_v55 }
  0xc7   : > { %1622 = vmatpush.msrb.mxu1 %v4225_v13  ;;  %1677 = vmatpush.msrb.mxu2 %v5997_v58  ;;  %v290_v13 = vld [vmem:[%s5782_s1 + $0xf8] sm:$0xff]  ;;  %v264_v58 = vld [vmem:[%s5782_s1 + $0x28] sm:$0xff] }
  0xc8   : > { %1732 = vmatpush.msrb.mxu3 %v4232_v61  ;;  %1587 = vmatpush.msrb.mxu0 %v4334_v32 }
  0xc9   : > { %1624 = vmatpush.msrb.mxu1 %v4232_v61  ;;  %1681 = vmatpush.msrb.mxu2 %v5998_v45  ;;  %v288_v61 = vld [vmem:[%s5782_s1 + $0xe8] sm:$0xff] }
  0xca   : > { %1734 = vmatpush.msrb.mxu3 %v4244_v38  ;;  %1590 = vmatpush.msrb.mxu0 %v4350_v37  ;;  %v4560_v32 = vand.u32 4294901760, %v288_v61  ;;  %v4596_v37 = vand.u32 4294901760, %v282_v51 }
  0xcb   : > { %1626 = vmatpush.msrb.mxu1 %v4244_v38  ;;  %1685 = vmatpush.msrb.mxu2 %v5999_v44  ;;  %v4550_v38 = vand.u32 4294901760, %v290_v13  ;;  %v4720_v44 = vand.u32 4294901760, %v266_v4 }
  0xcc   : > { %1736 = vmatpush.msrb.mxu3 %v4273_v29  ;;  %1593 = vmatpush.msrb.mxu0 %v4363_v57  ;;  %v4586_v55 = vsub.f32 %v288_v61, %v4560_v32  ;;  %v4630_v8 = vsub.f32 %v282_v51, %v4596_v37  ;;  %v5852_v51 = vand.u32 4294901760, %v4709_v41 }
  0xcd   : > { %1628 = vmatpush.msrb.mxu1 %v4273_v29  ;;  %1689 = vmatpush.msrb.mxu2 %v6000_v62  ;;  %v286_v29 = vld [vmem:[%s5782_s1 + $0xd8] sm:$0xff]  ;;  %v4573_v9 = vsub.f32 %v290_v13, %v4550_v38  ;;  %v4724_v62 = vsub.f32 %v270_v42, %v4691_v16  ;;  %v4754_v22 = vsub.f32 %v266_v4, %v4720_v44 }
  0xce   : > { %1738 = vmatpush.msrb.mxu3 %v4288_v18  ;;  %1596 = vmatpush.msrb.mxu0 %v4379_v39  ;;  %v4570_v30 = vand.u32 4294901760, %v286_v29  ;;  %v1858_v42 = vsub.f32 %v4709_v41, %v5852_v51 }
  0xcf   : > { %1630 = vmatpush.msrb.mxu1 %v4288_v18  ;;  %1693 = vmatpush.msrb.mxu2 %v6001_v63  ;;  %v284_v18 = vld [vmem:[%s5782_s1 + $0xc8] sm:$0xff]  ;;  %v262_v63 = vld [vmem:[%s5782_s1 + $0x18] sm:$0xff] }
  0xd0   : > { %1740 = vmatpush.msrb.mxu3 %v4304_v1  ;;  %1599 = vmatpush.msrb.mxu0 %v4396_v26  ;;  %v4600_v57 = vsub.f32 %v286_v29, %v4570_v30  ;;  %v278_v26 = vld [vmem:[%s5782_s1 + $0x98] sm:$0xff] }
  0xd1   : > { %1632 = vmatpush.msrb.mxu1 %v4304_v1  ;;  %1697 = vmatpush.msrb.mxu2 %v1522_v2  ;;  %v4583_v1 = vand.u32 4294901760, %v284_v18  ;;  %v276_v2 = vld [vmem:[%s5782_s1 + $0x88] sm:$0xff] }
  0xd2   : > { %1742 = vmatpush.msrb.mxu3 %v4321_v5  ;;  %1602 = vmatpush.msrb.mxu0 %v4417_v53  ;;  %v1809_v53 = vand.u32 4294901760, %v4586_v55 }
  0xd3   : > { %1634 = vmatpush.msrb.mxu1 %v4321_v5  ;;  %1701 = vmatpush.msrb.mxu2 %v1528_v11  ;;  %v280_v5 = vld [vmem:[%s5782_s1 + $0xa8] sm:$0xff]  ;;  %v4613_v39 = vsub.f32 %v284_v18, %v4583_v1  ;;  %v4621_v11 = vand.u32 4294901760, %v278_v26  ;;  %v4735_v18 = vand.u32 4294901760, %v264_v58 }
  0xd4   : > { %1744 = vmatpush.msrb.mxu3 %v4336_v0  ;;  %1605 = vmatpush.msrb.mxu0 %v4430_v12  ;;  %v4635_v12 = vand.u32 4294901760, %v276_v2 }
  0xd5   : > { %1636 = vmatpush.msrb.mxu1 %v4336_v0  ;;  %1705 = vmatpush.msrb.mxu2 %v1534_v20  ;;  %v1803_v0 = vand.u32 4294901760, %v4573_v9  ;;  %v5862_v20 = vand.u32 4294901760, %v4600_v57  ;;  %v5861_v15 = vand.u32 4294901760, %v4613_v39 }
  0xd6   : > { %1746 = vmatpush.msrb.mxu3 %v4352_v52  ;;  %1608 = vmatpush.msrb.mxu0 %v4448_v25  ;;  %v4652_v25 = vsub.f32 %v278_v26, %v4621_v11  ;;  %v4668_v3 = vsub.f32 %v276_v2, %v4635_v12  ;;  %v322_v2 = vld [vmem:[%s5782_s1 + $0x1f8] sm:$0xff] }
  0xd7   : > { %1638 = vmatpush.msrb.mxu1 %v4352_v52  ;;  %1709 = vmatpush.msrb.mxu2 %v1540_v27  ;;  %v4609_v52 = vand.u32 4294901760, %v280_v5  ;;  %v1810_v27 = vsub.f32 %v4586_v55, %v1809_v53  ;;  %v1816_v46 = vsub.f32 %v4600_v57, %v5862_v20  ;;  %v1822_v48 = vsub.f32 %v4613_v39, %v5861_v15  ;;  %v308_v20 = vld [vmem:[%s5782_s1 + $0x188] sm:$0xff] }
  0xd8   : > { %1748 = vmatpush.msrb.mxu3 %v4365_v36  ;;  %1611 = vmatmul.f32.vlgmr.msrb.gmra.mxu0 %v4437_v24  ;;  %v5856_v60 = vand.u32 4294901760, %v4652_v25  ;;  %v5855_v7 = vand.u32 4294901760, %v4668_v3 }
  0xd9   : > { %1761 = vmatpush.msra.mxu0 %v4550_v38  ;;  %1640 = vmatpush.msrb.mxu1 %v4365_v36  ;;  %v1804_v36 = vsub.f32 %v4573_v9, %v1803_v0  ;;  %v4647_v23 = vsub.f32 %v280_v5, %v4609_v52  ;;  %v1823_v54 = vand.u32 4294901760, %v1822_v48  ;;  %v4739_v5 = vsub.f32 %v268_v6, %v4706_v28 }
  0xda   : > { %1713 = vmatpush.msrb.mxu2 %v1546_v40  ;;  %1750 = vmatpush.msrb.mxu3 %v4388_v59  ;;  %v1840_v56 = vsub.f32 %v4652_v25, %v5856_v60  ;;  %v1846_v61 = vsub.f32 %v4668_v3, %v5855_v7  ;;  %v4767_v48 = vsub.f32 %v264_v58, %v4735_v18  ;;  %v4769_v6 = vand.u32 4294901760, %v322_v2  ;;  %v318_v58 = vld [vmem:[%s5782_s1 + $0x1d8] sm:$0xff] }
  0xdb   : > { %1763 = vmatpush.msra.mxu0 %v4560_v32  ;;  %1642 = vmatpush.msrb.mxu1 %v4388_v59  ;;  %v274_v59 = vld [vmem:[%s5782_s1 + $0x78] sm:$0xff]  ;;  %v1805_v40 = vand.u32 4294901760, %v1804_v36  ;;  %v5857_v19 = vand.u32 4294901760, %v4647_v23 }
  0xdc   : > { %1717 = vmatpush.msrb.mxu2 %v1552_v10  ;;  %1752 = vmatpush.msrb.mxu3 %v4401_v14  ;;  %v4662_v33 = vand.u32 4294901760, %v274_v59  ;;  %v1811_v10 = vand.u32 4294901760, %v1810_v27  ;;  %v1841_v26 = vand.u32 4294901760, %v1840_v56  ;;  %v5851_v27 = vand.u32 4294901760, %v4724_v62 }
  0xdd   : > { %1719 = vmatmul.f32.vlgmr.msrb.gmra.mxu2 %v4411_v50  ;;  %1765 = vmatpush.msra.mxu0 %v4570_v30  ;;  %v1834_v35 = vsub.f32 %v4647_v23, %v5857_v19 }
  0xde   : > { %1904 = vmatpush.msra.mxu2 %v4573_v9  ;;  %1644 = vmatpush.msrb.mxu1 %v4401_v14  ;;  %v5859_v14 = vand.u32 4294901760, %v4630_v8  ;;  %v4694_v21 = vsub.f32 %v274_v59, %v4662_v33  ;;  %v4750_v59 = vand.u32 4294901760, %v262_v63  ;;  %v306_v9 = vld [vmem:[%s5782_s1 + $0x178] sm:$0xff] }
  0xdf   : > { %1754 = vmatpush.msrb.mxu3 %v4424_v17  ;;  %1767 = vmatpush.msra.mxu0 %v4583_v1  ;;  %v1835_v29 = vand.u32 4294901760, %v1834_v35  ;;  %v5854_v35 = vand.u32 4294901760, %v4754_v22 }
  0xe0   : > { %1756 = vmatmul.f32.vlgmr.msrb.gmra.mxu3 %v4411_v50  ;;  %1907 = vmatpush.msra.mxu2 %v4586_v55  ;;  %v1828_v47 = vsub.f32 %v4630_v8, %v5859_v14  ;;  %v5853_v13 = vand.u32 4294901760, %v4694_v21  ;;  %v4784_v56 = vsub.f32 %v262_v63, %v4750_v59  ;;  %v5858_v63 = vand.u32 4294901760, %v4767_v48  ;;  %v310_v14 = vld [vmem:[%s5782_s1 + $0x198] sm:$0xff] }
  0xe1   : > { %1957 = vmatpush.msra.mxu3 %v4550_v38  ;;  %1646 = vmatpush.msrb.mxu1 %v4424_v17  ;;  %v1817_v17 = vand.u32 4294901760, %v1816_v46  ;;  %v1847_v46 = vand.u32 4294901760, %v1846_v61  ;;  %v1859_v61 = vand.u32 4294901760, %v1858_v42  ;;  %v4809_v42 = vand.u32 4294901760, %v318_v58 }
  0xe2   : > { %1650 = vmatmul.f32.vlgmr.msrb.gmra.mxu1 %v4456_v34  ;;  %1769 = vmatpush.msra.mxu0 %v4596_v37  ;;  %v1829_v45 = vand.u32 4294901760, %v1828_v47  ;;  %v1852_v36 = vsub.f32 %v4694_v21, %v5853_v13  ;;  %v5860_v51 = vand.u32 4294901760, %v4784_v56  ;;  %v6002_v55 = vand.u32 4294901760, %v4600_v57 }
  0xe3   : > { %1806 = vmatpush.msra.mxu1 %v1805_v40  ;;  %1910 = vmatpush.msra.mxu2 %v4600_v57  ;;  %v260_v40 = vld [vmem:[%s5782_s1 + $0x8] sm:$0xff]  ;;  %v4840_v19 = vsub.f32 %v318_v58, %v4809_v42  ;;  %v302_v57 = vld [vmem:[%s5782_s1 + $0x158] sm:$0xff] }
  0xe4   : > { %1959 = vmatpush.msra.mxu3 %v4560_v32  ;;  %1771 = vmatpush.msra.mxu0 %v4609_v52  ;;  %v4776_v47 = vand.u32 4294901760, %v260_v40  ;;  %v1853_v4 = vand.u32 4294901760, %v1852_v36  ;;  %v316_v36 = vld [vmem:[%s5782_s1 + $0x1c8] sm:$0xff]  ;;  %v4937_v50 = vand.u32 4294901760, %v302_v57 }
  0xe5   : > { %1812 = vmatpush.msra.mxu1 %v1811_v10  ;;  %1913 = vmatpush.msra.mxu2 %v4613_v39  ;;  %v5850_v10 = vand.u32 4294901760, %v4739_v5  ;;  %v4824_v13 = vand.u32 4294901760, %v316_v36 }
  0xe6   : > { %1961 = vmatpush.msra.mxu3 %v4570_v30  ;;  %1773 = vmatpush.msra.mxu0 %v4621_v11 }
  0xe7   : > { %1818 = vmatpush.msra.mxu1 %v1817_v17  ;;  %1916 = vmatpush.msra.mxu2 %v4630_v8  ;;  %v320_v17 = vld [vmem:[%s5782_s1 + $0x1e8] sm:$0xff] }
  0xe8   : > { %1963 = vmatpush.msra.mxu3 %v4583_v1  ;;  %1775 = vmatpush.msra.mxu0 %v4635_v12 }
  0xe9   : > { %1824 = vmatpush.msra.mxu1 %v1823_v54  ;;  %1919 = vmatpush.msra.mxu2 %v4647_v23  ;;  %v1864_v54 = vsub.f32 %v4724_v62, %v5851_v27  ;;  %v1876_v27 = vsub.f32 %v4754_v22, %v5854_v35  ;;  %v1882_v35 = vsub.f32 %v4767_v48, %v5858_v63 }
  0xea   : > { %1965 = vmatpush.msra.mxu3 %v4596_v37  ;;  %1777 = vmatpush.msra.mxu0 %v4662_v33 }
  0xeb   : > { %1830 = vmatpush.msra.mxu1 %v1829_v45  ;;  %1922 = vmatpush.msra.mxu2 %v4652_v25  ;;  %v4791_v45 = vand.u32 4294901760, %v320_v17 }
  0xec   : > { %1967 = vmatpush.msra.mxu3 %v4609_v52  ;;  %1779 = vmatpush.msra.mxu0 %v4678_v31 }
  0xed   : > { %1836 = vmatpush.msra.mxu1 %v1835_v29  ;;  %1925 = vmatpush.msra.mxu2 %v4668_v3  ;;  %v1870_v29 = vsub.f32 %v4739_v5, %v5850_v10  ;;  %v314_v10 = vld [vmem:[%s5782_s1 + $0x1b8] sm:$0xff] }
  0xee   : > { %1969 = vmatpush.msra.mxu3 %v4621_v11  ;;  %1781 = vmatpush.msra.mxu0 %v4691_v16  ;;  %v4834_v60 = vand.u32 4294901760, %v314_v10 }
  0xef   : > { %1842 = vmatpush.msra.mxu1 %v1841_v26  ;;  %1928 = vmatpush.msra.mxu2 %v4694_v21  ;;  %v4799_v26 = vsub.f32 %v322_v2, %v4769_v6  ;;  %v1865_v2 = vand.u32 4294901760, %v1864_v54  ;;  %v1871_v54 = vand.u32 4294901760, %v1870_v29  ;;  %v1888_v29 = vsub.f32 %v4784_v56, %v5860_v51 }
  0xf0   : > { %1971 = vmatpush.msra.mxu3 %v4635_v12  ;;  %1783 = vmatpush.msra.mxu0 %v4706_v28  ;;  %v4862_v15 = vsub.f32 %v314_v10, %v4834_v60 }
  0xf1   : > { %1848 = vmatpush.msra.mxu1 %v1847_v46  ;;  %1931 = vmatpush.msra.mxu2 %v4709_v41  ;;  %v4807_v46 = vsub.f32 %v260_v40, %v4776_v47  ;;  %v4822_v40 = vsub.f32 %v320_v17, %v4791_v45  ;;  %v5863_v7 = vand.u32 4294901760, %v4799_v26  ;;  %v1889_v10 = vand.u32 4294901760, %v1888_v29 }
  0xf2   : > { %1973 = vmatpush.msra.mxu3 %v4662_v33  ;;  %1785 = vmatpush.msra.mxu0 %v4720_v44  ;;  %v6006_v29 = vand.u32 4294901760, %v4862_v15 }
  0xf3   : > { %1854 = vmatpush.msra.mxu1 %v1853_v4  ;;  %1934 = vmatpush.msra.mxu2 %v4724_v62  ;;  %v312_v4 = vld [vmem:[%s5782_s1 + $0x1a8] sm:$0xff]  ;;  %v5864_v17 = vand.u32 4294901760, %v4807_v46  ;;  %v5865_v58 = vand.u32 4294901760, %v4822_v40  ;;  %v2145_v51 = vsub.f32 %v4799_v26, %v5863_v7 }
  0xf4   : > { %1975 = vmatpush.msra.mxu3 %v4678_v31  ;;  %1787 = vmatpush.msra.mxu0 %v4735_v18  ;;  %v4846_v63 = vand.u32 4294901760, %v312_v4  ;;  %v2169_v24 = vsub.f32 %v4862_v15, %v6006_v29 }
  0xf5   : > { %1860 = vmatpush.msra.mxu1 %v1859_v61  ;;  %1937 = vmatpush.msra.mxu2 %v4739_v5  ;;  %v1877_v61 = vand.u32 4294901760, %v1876_v27  ;;  %v1883_v27 = vand.u32 4294901760, %v1882_v35  ;;  %v1894_v35 = vsub.f32 %v4807_v46, %v5864_v17  ;;  %v4890_v17 = vand.u32 4294901760, %v308_v20 }
  0xf6   : > { %1977 = vmatpush.msra.mxu3 %v4691_v16  ;;  %1789 = vmatpush.msra.mxu0 %v4750_v59  ;;  %v4878_v7 = vsub.f32 %v312_v4, %v4846_v63  ;;  %v2146_v4 = vand.u32 4294901760, %v2145_v51  ;;  %v4906_v51 = vand.u32 4294901760, %v306_v9 }
  0xf7   : > { %1866 = vmatpush.msra.mxu1 %v1865_v2  ;;  %1940 = vmatpush.msra.mxu2 %v4754_v22  ;;  %v4855_v2 = vsub.f32 %v316_v36, %v4824_v13  ;;  %v304_v36 = vld [vmem:[%s5782_s1 + $0x168] sm:$0xff]  ;;  %v4920_v34 = vsub.f32 %v308_v20, %v4890_v17 }
  0xf8   : > { %1979 = vmatpush.msra.mxu3 %v4706_v28  ;;  %1791 = vmatpush.msra.mxu0 %v4776_v47 }
  0xf9   : > { %1872 = vmatpush.msra.mxu1 %v1871_v54  ;;  %1943 = vmatpush.msra.mxu2 %v4767_v48  ;;  %v4874_v54 = vand.u32 4294901760, %v310_v14 }
  0xfa   : > { %1981 = vmatpush.msra.mxu3 %v4720_v44  ;;  %1998 = vmatpush.msrb.mxu0 %v1803_v0  ;;  %v2151_v0 = vsub.f32 %v4822_v40, %v5865_v58  ;;  %v6003_v58 = vand.u32 4294901760, %v4840_v19 }
  0xfb   : > { %1878 = vmatpush.msra.mxu1 %v1877_v61  ;;  %1946 = vmatpush.msra.mxu2 %v4784_v56 }
  0xfc   : > { %1983 = vmatpush.msra.mxu3 %v4735_v18  ;;  %2002 = vmatpush.msrb.mxu0 %v1809_v53  ;;  %v1895_v53 = vand.u32 4294901760, %v1894_v35  ;;  %v2157_v61 = vsub.f32 %v4840_v19, %v6003_v58  ;;  %v6004_v35 = vand.u32 4294901760, %v4613_v39  ;;  %v2152_v58 = vand.u32 4294901760, %v2151_v0  ;;  %v300_v39 = vld [vmem:[%s5782_s1 + $0x148] sm:$0xff] }
  0xfd   : > { %1884 = vmatpush.msra.mxu1 %v1883_v27  ;;  %1949 = vmatpush.msra.mxu2 %v4807_v46  ;;  %v4904_v27 = vsub.f32 %v310_v14, %v4874_v54  ;;  %v6005_v14 = vand.u32 4294901760, %v4855_v2  ;;  %v6007_v0 = vand.u32 4294901760, %v4630_v8  ;;  %v298_v8 = vld [vmem:[%s5782_s1 + $0x138] sm:$0xff] }
  0xfe   : > { %1985 = vmatpush.msra.mxu3 %v4750_v59  ;;  %2006 = vmatpush.msrb.mxu0 %v6002_v55 }
  0xff   : > { %2102 = vmatpush.msrb.mxu2 %v4769_v6  ;;  %1890 = vmatpush.msra.mxu1 %v1889_v10  ;;  %v2163_v55 = vsub.f32 %v4855_v2, %v6005_v14  ;;  %v4922_v10 = vand.u32 4294901760, %v304_v36  ;;  %v5870_v20 = vand.u32 4294901760, %v4904_v27  ;;  %v4935_v14 = vsub.f32 %v306_v9, %v4906_v51 }
 0x100   : > { %1987 = vmatpush.msra.mxu3 %v4776_v47  ;;  %2010 = vmatpush.msrb.mxu0 %v6004_v35  ;;  %v2158_v35 = vand.u32 4294901760, %v2157_v61  ;;  %v6009_v61 = vand.u32 4294901760, %v4647_v23  ;;  %v6010_v23 = vand.u32 4294901760, %v4652_v25  ;;  %v6011_v25 = vand.u32 4294901760, %v4668_v3 }
 0x101   : > { %2104 = vmatpush.msrb.mxu2 %v4791_v45  ;;  %1896 = vmatpush.msra.mxu1 %v1895_v53  ;;  %v2164_v9 = vand.u32 4294901760, %v2163_v55  ;;  %v2186_v53 = vand.u32 4294901760, %v4920_v34  ;;  %v5871_v55 = vand.u32 4294901760, %v4935_v14  ;;  %v6012_v3 = vand.u32 4294901760, %v4694_v21 }
 0x102   : > { %2147 = vmatpush.msrb.mxu3 %v2146_v4  ;;  %2014 = vmatpush.msrb.mxu0 %v6007_v0  ;;  %v6008_v4 = vand.u32 4294901760, %v4878_v7  ;;  %v4951_v0 = vsub.f32 %v304_v36, %v4922_v10  ;;  %v2181_v36 = vsub.f32 %v4904_v27, %v5870_v20 }
 0x103   : > { %2065 = vmatpush.msrb.mxu1 %v4550_v38  ;;  %2106 = vmatpush.msrb.mxu2 %v4809_v42  ;;  %v4953_v38 = vand.u32 4294901760, %v300_v39 }
 0x104   : > { %v2175_v29 = vsub.f32 %v4878_v7, %v6008_v4  ;;  %2153 = vmatpush.msrb.mxu3 %v2152_v58  ;;  %2018 = vmatpush.msrb.mxu0 %v6009_v61  ;;  %v2170_v4 = vand.u32 4294901760, %v2169_v24  ;;  %v296_v58 = vld [vmem:[%s5782_s1 + $0x128] sm:$0xff]  ;;  %v4967_v61 = vsub.f32 %v302_v57, %v4937_v50 }
 0x105   : > { %2067 = vmatpush.msrb.mxu1 %v4560_v32  ;;  %2108 = vmatpush.msrb.mxu2 %v4824_v13  ;;  %v4969_v32 = vand.u32 4294901760, %v298_v8  ;;  %v4980_v57 = vsub.f32 %v300_v39, %v4953_v38  ;;  %v4982_v20 = vand.u32 4294901760, %v296_v58  ;;  %v2193_v39 = vsub.f32 %v4935_v14, %v5871_v55 }
 0x106   : > { %2159 = vmatpush.msrb.mxu3 %v2158_v35  ;;  %2022 = vmatpush.msrb.mxu0 %v6010_v23  ;;  %v2176_v24 = vand.u32 4294901760, %v2175_v29  ;;  %v2187_v35 = vsub.f32 %v4920_v34, %v2186_v53  ;;  %v2198_v23 = vand.u32 4294901760, %v4951_v0  ;;  %v2182_v29 = vand.u32 4294901760, %v2181_v36 }
 0x107   : > { %2069 = vmatpush.msrb.mxu1 %v4570_v30  ;;  %2110 = vmatpush.msrb.mxu2 %v4834_v60  ;;  %v294_v30 = vld [vmem:[%s5782_s1 + $0x118] sm:$0xff]  ;;  %v5012_v55 = vsub.f32 %v296_v58, %v4982_v20  ;;  %v6015_v58 = vand.u32 4294901760, %v4739_v5 }
 0x108   : > { %2165 = vmatpush.msrb.mxu3 %v2164_v9  ;;  %2026 = vmatpush.msrb.mxu0 %v6011_v25  ;;  %v2204_v9 = vand.u32 4294901760, %v4967_v61  ;;  %v4996_v25 = vsub.f32 %v298_v8, %v4969_v32  ;;  %v5003_v21 = vand.u32 4294901760, %v294_v30  ;;  %v2188_v36 = vand.u32 4294901760, %v2187_v35 }
 0x109   : > { %2071 = vmatpush.msrb.mxu1 %v4583_v1  ;;  %2112 = vmatpush.msrb.mxu2 %v4846_v63  ;;  %v292_v1 = vld [vmem:[%s5782_s1 + $0x108] sm:$0xff]  ;;  %v2199_v8 = vsub.f32 %v4951_v0, %v2198_v23 }
 0x10a   : > { %2171 = vmatpush.msrb.mxu3 %v2170_v4  ;;  %2030 = vmatpush.msrb.mxu0 %v6012_v3  ;;  %v6013_v4 = vand.u32 4294901760, %v4709_v41  ;;  %v2210_v3 = vand.u32 4294901760, %v4980_v57  ;;  %v6014_v41 = vand.u32 4294901760, %v4724_v62  ;;  %v2205_v35 = vsub.f32 %v4967_v61, %v2204_v9 }
 0x10b   : > { %2073 = vmatpush.msrb.mxu1 %v4596_v37  ;;  %2114 = vmatpush.msrb.mxu2 %v4874_v54  ;;  %v5016_v37 = vand.u32 4294901760, %v292_v1  ;;  %v2200_v62 = vand.u32 4294901760, %v2199_v8  ;;  %v6017_v8 = vand.u32 4294901760, %v4767_v48 }
 0x10c   : > { %2177 = vmatpush.msrb.mxu3 %v2176_v24  ;;  %2034 = vmatpush.msrb.mxu0 %v6013_v4  ;;  %v2194_v24 = vand.u32 4294901760, %v2193_v39  ;;  %v2216_v4 = vand.u32 4294901760, %v4996_v25  ;;  %v2222_v39 = vand.u32 4294901760, %v5012_v55  ;;  %v2206_v5 = vand.u32 4294901760, %v2205_v35 }
 0x10d   : > { %2075 = vmatpush.msrb.mxu1 %v4609_v52  ;;  %2116 = vmatpush.msrb.mxu2 %v4890_v17  ;;  %v5027_v52 = vsub.f32 %v294_v30, %v5003_v21  ;;  %v6016_v30 = vand.u32 4294901760, %v4754_v22 }
 0x10e   : > { %2183 = vmatpush.msrb.mxu3 %v2182_v29  ;;  %2038 = vmatpush.msrb.mxu0 %v6014_v41  ;;  %v2211_v29 = vsub.f32 %v4980_v57, %v2210_v3  ;;  %v2223_v22 = vsub.f32 %v5012_v55, %v2222_v39 }
 0x10f   : > { %2077 = vmatpush.msrb.mxu1 %v4621_v11  ;;  %2118 = vmatpush.msrb.mxu2 %v4906_v51  ;;  %v5038_v11 = vsub.f32 %v292_v1, %v5016_v37 }
 0x110   : > { %2189 = vmatpush.msrb.mxu3 %v2188_v36  ;;  %2042 = vmatpush.msrb.mxu0 %v6015_v58  ;;  %v2217_v36 = vsub.f32 %v4996_v25, %v2216_v4  ;;  %v2212_v1 = vand.u32 4294901760, %v2211_v29  ;;  %v2224_v35 = vand.u32 4294901760, %v2223_v22  ;;  %v6024_v29 = vld [vmem:[#allocation14_spill] sm:$0xff]  ;;  %v334_v22 = vld [vmem:[%s5782_s1 + $0x258] sm:$0xff] }
 0x111   : > { %2079 = vmatpush.msrb.mxu1 %v4635_v12  ;;  %2120 = vmatpush.msrb.mxu2 %v4922_v10  ;;  %v2228_v12 = vand.u32 4294901760, %v5027_v52  ;;  %v2234_v41 = vand.u32 4294901760, %v5038_v11 }
 0x112   : > { %2195 = vmatpush.msrb.mxu3 %v2194_v24  ;;  %2046 = vmatpush.msrb.mxu0 %v6016_v30  ;;  %v2218_v24 = vand.u32 4294901760, %v2217_v36  ;;  %v6025_v30 = vand.u32 4294901760, %v4822_v40 }
 0x113   : > { %2081 = vmatpush.msrb.mxu1 %v4662_v33  ;;  %2122 = vmatpush.msrb.mxu2 %v4937_v50  ;;  %v6018_v33 = vand.u32 4294901760, %v4784_v56  ;;  %v2229_v48 = vsub.f32 %v5027_v52, %v2228_v12  ;;  %v2235_v56 = vsub.f32 %v5038_v11, %v2234_v41 }
 0x114   : > { %2201 = vmatpush.msrb.mxu3 %v2200_v62  ;;  %2050 = vmatpush.msrb.mxu0 %v6017_v8  ;;  %v6022_v62 = vld [vmem:[#allocation4_spill] sm:$0xff] }
 0x115   : > { %2083 = vmatpush.msrb.mxu1 %v4678_v31  ;;  %2124 = vmatpush.msrb.mxu2 %v4953_v38  ;;  %v6019_v31 = vand.u32 4294901760, %v4807_v46  ;;  %v2230_v58 = vand.u32 4294901760, %v2229_v48  ;;  %v6021_v46 = vld [vmem:[#allocation3_spill] sm:$0xff] }
 0x116   : > { %2207 = vmatpush.msrb.mxu3 %v2206_v5  ;;  %2054 = vmatpush.msrb.mxu0 %v6018_v33  ;;  %v336_v5 = vld [vmem:[%s5782_s1 + $0x268] sm:$0xff] }
 0x117   : > { %2085 = vmatpush.msrb.mxu1 %v4691_v16  ;;  %2126 = vmatpush.msrb.mxu2 %v4969_v32  ;;  %v6020_v16 = vld [vmem:[#allocation7_spill] sm:$0xff] }
 0x118   : > { %2213 = vmatpush.msrb.mxu3 %v2212_v1  ;;  %2058 = vmatpush.msrb.mxu0 %v6019_v31  ;;  %v6035_v31 = vld [vmem:[#allocation17_spill] sm:$0xff] }
 0x119   : > { %2087 = vmatpush.msrb.mxu1 %v4706_v28  ;;  %2128 = vmatpush.msrb.mxu2 %v4982_v20  ;;  %v2236_v28 = vand.u32 4294901760, %v2235_v56 }
 0x11a   : > { %2219 = vmatpush.msrb.mxu3 %v2218_v24  ;;  %1797 = vmatmul.f32.vlgmr.msra.gmra.mxu0 %v6020_v16  ;;  %v5264_v24 = vand.u32 4294901760, %v336_v5 }
 0x11b   : > { %2245 = vmatpush.msra.mxu0 %v4799_v26  ;;  %2089 = vmatpush.msrb.mxu1 %v4720_v44  ;;  %v6023_v44 = vand.u32 4294901760, %v4799_v26  ;;  %v6028_v26 = vand.u32 4294901760, %v4855_v2 }
 0x11c   : > { %2130 = vmatpush.msrb.mxu2 %v5003_v21  ;;  %2225 = vmatpush.msrb.mxu3 %v2224_v35 }
 0x11d   : > { %1952 = vmatmul.f32.vlgmr.msra.gmra.mxu2 %v6021_v46  ;;  %2248 = vmatpush.msra.mxu0 %v4822_v40 }
 0x11e   : > { %2091 = vmatpush.msrb.mxu1 %v4735_v18  ;;  %2132 = vmatpush.msrb.mxu2 %v5016_v37  ;;  %v6026_v18 = vand.u32 4294901760, %v4840_v19 }
 0x11f   : > { %2231 = vmatpush.msrb.mxu3 %v2230_v58  ;;  %2251 = vmatpush.msra.mxu0 %v4840_v19  ;;  %v6030_v19 = vand.u32 4294901760, %v4862_v15  ;;  %v5281_v58 = vand.u32 4294901760, %v334_v22 }
 0x120   : > { %1991 = vmatmul.f32.vlgmr.msra.gmra.mxu3 %v6022_v62  ;;  %2339 = vmatpush.msra.mxu2 %v6023_v44  ;;  %v330_v62 = vld [vmem:[%s5782_s1 + $0x238] sm:$0xff] }
 0x121   : > { %2093 = vmatpush.msrb.mxu1 %v4750_v59  ;;  %2237 = vmatpush.msrb.mxu3 %v2236_v28  ;;  %v6027_v59 = vld [vmem:[#allocation5_spill] sm:$0xff] }
 0x122   : > { %1898 = vmatmul.f32.vlgmr.msra.gmra.mxu1 %v6024_v29  ;;  %2254 = vmatpush.msra.mxu0 %v4855_v2  ;;  %v346_v2 = vld [vmem:[%s5782_s1 + $0x2b8] sm:$0xff] }
 0x123   : > { %2343 = vmatpush.msra.mxu2 %v6025_v30  ;;  %2406 = vmatpush.msra.mxu3 %v4769_v6 }
 0x124   : > { %2095 = vmatpush.msrb.mxu1 %v4776_v47  ;;  %2257 = vmatpush.msra.mxu0 %v4862_v15  ;;  %v6029_v47 = vld [vmem:[#allocation15_spill] sm:$0xff]  ;;  %v6032_v15 = vand.u32 4294901760, %v4904_v27 }
 0x125   : > { %2347 = vmatpush.msra.mxu2 %v6026_v18  ;;  %2408 = vmatpush.msra.mxu3 %v4791_v45  ;;  %v5297_v18 = vsub.f32 %v336_v5, %v5264_v24 }
 0x126   : > { %2298 = vmatpush.msra.mxu1 %v4769_v6  ;;  %2138 = vmatmul.f32.vlgmr.msrb.gmra.mxu2 %v6027_v59  ;;  %v6031_v6 = vand.u32 4294901760, %v4878_v7 }
 0x127   : > { %2260 = vmatpush.msra.mxu0 %v4878_v7  ;;  %2351 = vmatpush.msra.mxu2 %v6028_v26  ;;  %v6033_v7 = vand.u32 4294901760, %v4935_v14  ;;  %v328_v26 = vld [vmem:[%s5782_s1 + $0x228] sm:$0xff] }
 0x128   : > { %2300 = vmatpush.msra.mxu1 %v4791_v45  ;;  %2410 = vmatpush.msra.mxu3 %v4809_v42  ;;  %v350_v45 = vld [vmem:[%s5782_s1 + $0x2d8] sm:$0xff] }
 0x129   : > { %2060 = vmatmul.f32.vlgmr.msrb.gmra.mxu0 %v6024_v29  ;;  %2239 = vmatmul.f32.vlgmr.msrb.gmra.mxu3 %v6029_v47  ;;  %v5158_v40 = vand.u32 4294901760, %v350_v45 }
 0x12a   : > { %2263 = vmatpush.msra.mxu0 %v4904_v27  ;;  %2302 = vmatpush.msra.mxu1 %v4809_v42  ;;  %v348_v42 = vld [vmem:[%s5782_s1 + $0x2c8] sm:$0xff] }
 0x12b   : > { %2355 = vmatpush.msra.mxu2 %v6030_v19  ;;  %2412 = vmatpush.msra.mxu3 %v4824_v13 }
 0x12c   : > { %2097 = vmatmul.f32.vlgmr.msrb.gmra.mxu1 %v6024_v29  ;;  %2266 = vmatpush.msra.mxu0 %v4920_v34  ;;  %v352_v34 = vld [vmem:[%s5782_s1 + $0x2e8] sm:$0xff] }
 0x12d   : > { %2304 = vmatpush.msra.mxu1 %v4824_v13  ;;  %2359 = vmatpush.msra.mxu2 %v6031_v6  ;;  %v5309_v6 = vand.u32 4294901760, %v330_v62 }
 0x12e   : > { %2414 = vmatpush.msra.mxu3 %v4834_v60  ;;  %2269 = vmatpush.msra.mxu0 %v4935_v14  ;;  %v5188_v14 = vsub.f32 %v350_v45, %v5158_v40  ;;  %v5876_v45 = vand.u32 4294901760, %v5297_v18 }
 0x12f   : > { %2306 = vmatpush.msra.mxu1 %v4834_v60  ;;  %2363 = vmatpush.msra.mxu2 %v6032_v15  ;;  %v354_v60 = vld [vmem:[%s5782_s1 + $0x2f8] sm:$0xff]  ;;  %v5312_v15 = vsub.f32 %v334_v22, %v5281_v58 }
 0x130   : > { %2416 = vmatpush.msra.mxu3 %v4846_v63  ;;  %2272 = vmatpush.msra.mxu0 %v4951_v0  ;;  %v5138_v13 = vand.u32 4294901760, %v354_v60 }
 0x131   : > { %2308 = vmatpush.msra.mxu1 %v4846_v63  ;;  %2367 = vmatpush.msra.mxu2 %v2186_v53  ;;  %v5148_v63 = vand.u32 4294901760, %v352_v34  ;;  %v6034_v53 = vld [vmem:[#allocation16_spill] sm:$0xff] }
 0x132   : > { %2418 = vmatpush.msra.mxu3 %v4874_v54  ;;  %2275 = vmatpush.msra.mxu0 %v4967_v61 }
 0x133   : > { %2310 = vmatpush.msra.mxu1 %v4874_v54  ;;  %2371 = vmatpush.msra.mxu2 %v6033_v7  ;;  %v5171_v54 = vand.u32 4294901760, %v348_v42  ;;  %v5174_v27 = vsub.f32 %v352_v34, %v5148_v63  ;;  %v5320_v34 = vand.u32 4294901760, %v328_v26 }
 0x134   : > { %2420 = vmatpush.msra.mxu3 %v4890_v17  ;;  %2278 = vmatpush.msra.mxu0 %v4980_v57 }
 0x135   : > { %2312 = vmatpush.msra.mxu1 %v4890_v17  ;;  %2375 = vmatpush.msra.mxu2 %v2198_v23  ;;  %v5161_v17 = vsub.f32 %v354_v60, %v5138_v13  ;;  %v5201_v61 = vsub.f32 %v348_v42, %v5171_v54  ;;  %v340_v23 = vld [vmem:[%s5782_s1 + $0x288] sm:$0xff]  ;;  %v5355_v22 = vsub.f32 %v328_v26, %v5320_v34 }
 0x136   : > { %2422 = vmatpush.msra.mxu3 %v4906_v51  ;;  %2281 = vmatpush.msra.mxu0 %v4996_v25 }
 0x137   : > { %2314 = vmatpush.msra.mxu1 %v4906_v51  ;;  %2379 = vmatpush.msra.mxu2 %v2204_v9  ;;  %v344_v51 = vld [vmem:[%s5782_s1 + $0x2a8] sm:$0xff]  ;;  %v2497_v9 = vand.u32 4294901760, %v5188_v14  ;;  %v5873_v26 = vand.u32 4294901760, %v5355_v22 }
 0x138   : > { %2424 = vmatpush.msra.mxu3 %v4922_v10  ;;  %2284 = vmatpush.msra.mxu0 %v5012_v55  ;;  %v5192_v0 = vand.u32 4294901760, %v344_v51  ;;  %v2491_v55 = vand.u32 4294901760, %v5174_v27 }
 0x139   : > { %2316 = vmatpush.msra.mxu1 %v4922_v10  ;;  %2383 = vmatpush.msra.mxu2 %v2210_v3  ;;  %v2485_v10 = vand.u32 4294901760, %v5161_v17  ;;  %v338_v3 = vld [vmem:[%s5782_s1 + $0x278] sm:$0xff] }
 0x13a   : > { %2426 = vmatpush.msra.mxu3 %v4937_v50  ;;  %2287 = vmatpush.msra.mxu0 %v5027_v52  ;;  %v5234_v52 = vand.u32 4294901760, %v340_v23 }
 0x13b   : > { %2318 = vmatpush.msra.mxu1 %v4937_v50  ;;  %2387 = vmatpush.msra.mxu2 %v2216_v4  ;;  %v5184_v50 = vand.u32 4294901760, %v346_v2  ;;  %v2492_v4 = vsub.f32 %v5174_v27, %v2491_v55 }
 0x13c   : > { %2428 = vmatpush.msra.mxu3 %v4953_v38  ;;  %2290 = vmatpush.msra.mxu0 %v5038_v11  ;;  %v5239_v11 = vand.u32 4294901760, %v338_v3  ;;  %v5267_v48 = vsub.f32 %v340_v23, %v5234_v52  ;;  %v5337_v23 = vsub.f32 %v330_v62, %v5309_v6 }
 0x13d   : > { %2320 = vmatpush.msra.mxu1 %v4953_v38  ;;  %2391 = vmatpush.msra.mxu2 %v2222_v39  ;;  %v342_v38 = vld [vmem:[%s5782_s1 + $0x298] sm:$0xff]  ;;  %v5218_v25 = vsub.f32 %v346_v2, %v5184_v50  ;;  %v2503_v39 = vand.u32 4294901760, %v5201_v61 }
 0x13e   : > { %2430 = vmatpush.msra.mxu3 %v4969_v32  ;;  %2293 = vmatmul.f32.vlgmr.msra.gmra.mxu0 %v6034_v53  ;;  %v5214_v57 = vand.u32 4294901760, %v342_v38  ;;  %v5272_v35 = vsub.f32 %v338_v3, %v5239_v11  ;;  %v5878_v30 = vand.u32 4294901760, %v5267_v48  ;;  %v326_v2 = vld [vmem:[%s5782_s1 + $0x218] sm:$0xff]  ;;  %v324_v3 = vld [vmem:[%s5782_s1 + $0x208] sm:$0xff] }
 0x13f   : > { %2443 = vmatpush.msrb.mxu0 %v5138_v13  ;;  %2322 = vmatpush.msra.mxu1 %v4969_v32  ;;  %v2486_v32 = vsub.f32 %v5161_v17, %v2485_v10  ;;  %v2509_v8 = vand.u32 4294901760, %v5218_v25  ;;  %v2504_v33 = vsub.f32 %v5201_v61, %v2503_v39 }
 0x140   : > { %2395 = vmatpush.msra.mxu2 %v2228_v12  ;;  %2432 = vmatpush.msra.mxu3 %v4982_v20  ;;  %v2498_v12 = vsub.f32 %v5188_v14, %v2497_v9  ;;  %v5251_v1 = vsub.f32 %v342_v38, %v5214_v57  ;;  %v5877_v59 = vand.u32 4294901760, %v5272_v35  ;;  %v2528_v7 = vsub.f32 %v5267_v48, %v5878_v30  ;;  %v6036_v30 = vld [vmem:[#allocation10_spill] sm:$0xff] }
 0x141   : > { %2445 = vmatpush.msrb.mxu0 %v5148_v63  ;;  %2324 = vmatpush.msra.mxu1 %v4982_v20  ;;  %v5227_v20 = vsub.f32 %v344_v51, %v5192_v0  ;;  %v2487_v36 = vand.u32 4294901760, %v2486_v32  ;;  %v2510_v16 = vsub.f32 %v5218_v25, %v2509_v8  ;;  %v2505_v44 = vand.u32 4294901760, %v2504_v33 }
 0x142   : > { %2399 = vmatpush.msra.mxu2 %v2234_v41  ;;  %2434 = vmatpush.msra.mxu3 %v5003_v21  ;;  %v2493_v41 = vand.u32 4294901760, %v2492_v4  ;;  %v2499_v56 = vand.u32 4294901760, %v2498_v12  ;;  %v5880_v46 = vand.u32 4294901760, %v5251_v1  ;;  %v2534_v51 = vsub.f32 %v5272_v35, %v5877_v59  ;;  %v386_v4 = vld [vmem:[%s5782_s1 + $0x3f8] sm:$0xff] }
 0x143   : > { %2401 = vmatmul.f32.vlgmr.msra.gmra.mxu2 %v6029_v47  ;;  %2447 = vmatpush.msrb.mxu0 %v5158_v40  ;;  %v5875_v38 = vand.u32 4294901760, %v5312_v15  ;;  %v5341_v32 = vand.u32 4294901760, %v326_v2  ;;  %v2529_v5 = vand.u32 4294901760, %v2528_v7 }
 0x144   : > { %2586 = vmatpush.msrb.mxu2 %v5161_v17  ;;  %2326 = vmatpush.msra.mxu1 %v5003_v21  ;;  %v5883_v21 = vand.u32 4294901760, %v5227_v20  ;;  %v2522_v19 = vsub.f32 %v5251_v1, %v5880_v46 }
 0x145   : > { %2436 = vmatpush.msra.mxu3 %v5016_v37  ;;  %2449 = vmatpush.msrb.mxu0 %v5171_v54  ;;  %v2546_v33 = vsub.f32 %v5312_v15, %v5875_v38 }
 0x146   : > { %2438 = vmatmul.f32.vlgmr.msra.gmra.mxu3 %v6029_v47  ;;  %2589 = vmatpush.msrb.mxu2 %v5174_v27  ;;  %v2516_v28 = vsub.f32 %v5227_v20, %v5883_v21  ;;  %v2511_v47 = vand.u32 4294901760, %v2510_v16  ;;  %v2523_v53 = vand.u32 4294901760, %v2522_v19  ;;  %v384_v16 = vld [vmem:[%s5782_s1 + $0x3e8] sm:$0xff] }
 0x147   : > { %2639 = vmatpush.msrb.mxu3 %v5138_v13  ;;  %2328 = vmatpush.msra.mxu1 %v5016_v37  ;;  %v332_v37 = vld [vmem:[%s5782_s1 + $0x248] sm:$0xff]  ;;  %v5386_v19 = vand.u32 4294901760, %v384_v16 }
 0x148   : > { %2332 = vmatmul.f32.vlgmr.msra.gmra.mxu1 %v6035_v31  ;;  %2451 = vmatpush.msrb.mxu0 %v5184_v50  ;;  %v5293_v29 = vand.u32 4294901760, %v332_v37  ;;  %v2517_v60 = vand.u32 4294901760, %v2516_v28  ;;  %v5363_v31 = vand.u32 4294901760, %v324_v3  ;;  %v5374_v28 = vsub.f32 %v326_v2, %v5341_v32  ;;  %v368_v21 = vld [vmem:[%s5782_s1 + $0x368] sm:$0xff] }
 0x149   : > { %2488 = vmatpush.msrb.mxu1 %v2487_v36  ;;  %2592 = vmatpush.msrb.mxu2 %v5188_v14  ;;  %v2540_v36 = vsub.f32 %v5297_v18, %v5876_v45 }
 0x14a   : > { %2641 = vmatpush.msrb.mxu3 %v5148_v63  ;;  %2453 = vmatpush.msrb.mxu0 %v5192_v0  ;;  %v5324_v42 = vsub.f32 %v332_v37, %v5293_v29  ;;  %v5872_v37 = vand.u32 4294901760, %v5337_v23  ;;  %v5393_v2 = vsub.f32 %v324_v3, %v5363_v31 }
 0x14b   : > { %2494 = vmatpush.msrb.mxu1 %v2493_v41  ;;  %2595 = vmatpush.msrb.mxu2 %v5201_v61  ;;  %v2535_v41 = vand.u32 4294901760, %v2534_v51  ;;  %v2541_v62 = vand.u32 4294901760, %v2540_v36  ;;  %v5514_v61 = vand.u32 4294901760, %v368_v21 }
 0x14c   : > { %2643 = vmatpush.msrb.mxu3 %v5158_v40  ;;  %2455 = vmatpush.msrb.mxu0 %v5214_v57  ;;  %v5874_v12 = vand.u32 4294901760, %v5324_v42  ;;  %v2558_v7 = vsub.f32 %v5337_v23, %v5872_v37 }
 0x14d   : > { %2500 = vmatpush.msrb.mxu1 %v2499_v56  ;;  %2598 = vmatpush.msrb.mxu2 %v5218_v25  ;;  %v5366_v56 = vand.u32 4294901760, %v386_v4  ;;  %v362_v25 = vld [vmem:[%s5782_s1 + $0x338] sm:$0xff] }
 0x14e   : > { %2645 = vmatpush.msrb.mxu3 %v5171_v54  ;;  %2457 = vmatpush.msrb.mxu0 %v5234_v52 }
 0x14f   : > { %2506 = vmatpush.msrb.mxu1 %v2505_v44  ;;  %2601 = vmatpush.msrb.mxu2 %v5227_v20  ;;  %v2552_v44 = vsub.f32 %v5324_v42, %v5874_v12  ;;  %v5396_v51 = vsub.f32 %v386_v4, %v5366_v56  ;;  %v2564_v4 = vsub.f32 %v5355_v22, %v5873_v26  ;;  %v5882_v12 = vand.u32 4294901760, %v5393_v2 }
 0x150   : > { %2647 = vmatpush.msrb.mxu3 %v5184_v50  ;;  %2459 = vmatpush.msrb.mxu0 %v5239_v11 }
 0x151   : > { %2512 = vmatpush.msrb.mxu1 %v2511_v47  ;;  %2604 = vmatpush.msrb.mxu2 %v5251_v1  ;;  %v382_v47 = vld [vmem:[%s5782_s1 + $0x3d8] sm:$0xff]  ;;  %v2553_v3 = vand.u32 4294901760, %v2552_v44  ;;  %v2559_v44 = vand.u32 4294901760, %v2558_v7  ;;  %v5881_v26 = vand.u32 4294901760, %v5396_v51  ;;  %v2565_v7 = vand.u32 4294901760, %v2564_v4 }
 0x152   : > { %2649 = vmatpush.msrb.mxu3 %v5192_v0  ;;  %2461 = vmatpush.msrb.mxu0 %v5264_v24  ;;  %v5404_v36 = vand.u32 4294901760, %v382_v47  ;;  %v2576_v4 = vsub.f32 %v5393_v2, %v5882_v12 }
 0x153   : > { %2518 = vmatpush.msrb.mxu1 %v2517_v60  ;;  %2607 = vmatpush.msrb.mxu2 %v5267_v48  ;;  %v2547_v60 = vand.u32 4294901760, %v2546_v33  ;;  %v5416_v33 = vsub.f32 %v384_v16, %v5386_v19 }
 0x154   : > { %2651 = vmatpush.msrb.mxu3 %v5214_v57  ;;  %2463 = vmatpush.msrb.mxu0 %v5281_v58  ;;  %v5432_v38 = vsub.f32 %v382_v47, %v5404_v36 }
 0x155   : > { %2524 = vmatpush.msrb.mxu1 %v2523_v53  ;;  %2610 = vmatpush.msrb.mxu2 %v5272_v35  ;;  %v380_v53 = vld [vmem:[%s5782_s1 + $0x3c8] sm:$0xff] }
 0x156   : > { %2653 = vmatpush.msrb.mxu3 %v5234_v52  ;;  %2465 = vmatpush.msrb.mxu0 %v5293_v29  ;;  %v5418_v37 = vand.u32 4294901760, %v380_v53 }
 0x157   : > { %2530 = vmatpush.msrb.mxu1 %v2529_v5  ;;  %2613 = vmatpush.msrb.mxu2 %v5297_v18  ;;  %v5879_v5 = vand.u32 4294901760, %v5374_v28 }
 0x158   : > { %2655 = vmatpush.msrb.mxu3 %v5239_v11  ;;  %2467 = vmatpush.msrb.mxu0 %v5309_v6  ;;  %v5446_v47 = vsub.f32 %v380_v53, %v5418_v37 }
 0x159   : > { %2536 = vmatpush.msrb.mxu1 %v2535_v41  ;;  %2616 = vmatpush.msrb.mxu2 %v5312_v15  ;;  %v378_v41 = vld [vmem:[%s5782_s1 + $0x3b8] sm:$0xff]  ;;  %v2570_v16 = vsub.f32 %v5374_v28, %v5879_v5  ;;  %v5884_v5 = vand.u32 4294901760, %v5416_v33 }
 0x15a   : > { %2657 = vmatpush.msrb.mxu3 %v5264_v24  ;;  %2469 = vmatpush.msrb.mxu0 %v5320_v34  ;;  %v5434_v45 = vand.u32 4294901760, %v378_v41 }
 0x15b   : > { %2542 = vmatpush.msrb.mxu1 %v2541_v62  ;;  %2619 = vmatpush.msrb.mxu2 %v5324_v42  ;;  %v376_v62 = vld [vmem:[%s5782_s1 + $0x3a8] sm:$0xff]  ;;  %v2571_v17 = vand.u32 4294901760, %v2570_v16  ;;  %v5886_v16 = vand.u32 4294901760, %v5446_v47 }
 0x15c   : > { %2659 = vmatpush.msrb.mxu3 %v5281_v58  ;;  %2471 = vmatpush.msrb.mxu0 %v5341_v32  ;;  %v5440_v59 = vand.u32 4294901760, %v376_v62  ;;  %v5465_v53 = vsub.f32 %v378_v41, %v5434_v45  ;;  %v2833_v41 = vsub.f32 %v5416_v33, %v5884_v5 }
 0x15d   : > { %2548 = vmatpush.msrb.mxu1 %v2547_v60  ;;  %2622 = vmatpush.msrb.mxu2 %v5337_v23  ;;  %v374_v60 = vld [vmem:[%s5782_s1 + $0x398] sm:$0xff] }
 0x15e   : > { %2661 = vmatpush.msrb.mxu3 %v5293_v29  ;;  %2473 = vmatpush.msrb.mxu0 %v5363_v31  ;;  %v5456_v46 = vand.u32 4294901760, %v374_v60 }
 0x15f   : > { %2554 = vmatpush.msrb.mxu1 %v2553_v3  ;;  %2625 = vmatpush.msrb.mxu2 %v5355_v22  ;;  %v2827_v3 = vsub.f32 %v5396_v51, %v5881_v26  ;;  %v370_v26 = vld [vmem:[%s5782_s1 + $0x378] sm:$0xff] }
 0x160   : > { %2663 = vmatpush.msrb.mxu3 %v5309_v6  ;;  %2479 = vmatmul.f32.vlgmr.msrb.gmra.mxu0 %v6036_v30  ;;  %v372_v30 = vld [vmem:[%s5782_s1 + $0x388] sm:$0xff]  ;;  %v5487_v12 = vsub.f32 %v374_v60, %v5456_v46  ;;  %v5497_v14 = vand.u32 4294901760, %v370_v26  ;;  %v366_v60 = vld [vmem:[%s5782_s1 + $0x358] sm:$0xff] }
 0x161   : > { %2680 = vmatpush.msra.mxu0 %v2485_v10  ;;  %2560 = vmatpush.msrb.mxu1 %v2559_v44  ;;  %v5885_v10 = vand.u32 4294901760, %v5432_v38  ;;  %v5470_v44 = vsub.f32 %v376_v62, %v5440_v59  ;;  %v5481_v27 = vand.u32 4294901760, %v372_v30  ;;  %v2828_v62 = vand.u32 4294901760, %v2827_v3  ;;  %v6038_v3 = vld [vmem:[#allocation6_spill] sm:$0xff] }
 0x162   : > { %2628 = vmatpush.msrb.mxu2 %v5374_v28  ;;  %2665 = vmatpush.msrb.mxu3 %v5320_v34 }
 0x163   : > { %2684 = vmatpush.msra.mxu0 %v2491_v55  ;;  %2566 = vmatpush.msrb.mxu1 %v2565_v7  ;;  %v6037_v55 = vld [vmem:[#allocation8_spill] sm:$0xff]  ;;  %v2577_v7 = vand.u32 4294901760, %v2576_v4  ;;  %v2839_v5 = vsub.f32 %v5432_v38, %v5885_v10  ;;  %v2834_v4 = vand.u32 4294901760, %v2833_v41  ;;  %v5512_v10 = vsub.f32 %v372_v30, %v5481_v27 }
 0x164   : > { %2631 = vmatpush.msrb.mxu2 %v5393_v2  ;;  %2667 = vmatpush.msrb.mxu3 %v5341_v32 }
 0x165   : > { %2634 = vmatmul.f32.vlgmr.msrb.gmra.mxu2 %v6037_v55  ;;  %2688 = vmatpush.msra.mxu0 %v2497_v9  ;;  %v5887_v55 = vand.u32 4294901760, %v5465_v53  ;;  %v5888_v9 = vand.u32 4294901760, %v5470_v44  ;;  %v2840_v41 = vand.u32 4294901760, %v2839_v5  ;;  %v5890_v5 = vand.u32 4294901760, %v5512_v10 }
 0x166   : > { %2784 = vmatpush.msra.mxu2 %v5366_v56  ;;  %2572 = vmatpush.msrb.mxu1 %v2571_v17  ;;  %v2845_v17 = vsub.f32 %v5446_v47, %v5886_v16  ;;  %v5527_v16 = vsub.f32 %v370_v26, %v5497_v14 }
 0x167   : > { %2669 = vmatpush.msrb.mxu3 %v5363_v31  ;;  %2692 = vmatpush.msra.mxu0 %v2503_v39  ;;  %v5889_v39 = vand.u32 4294901760, %v5487_v12  ;;  %v2851_v30 = vsub.f32 %v5465_v53, %v5887_v55  ;;  %v5543_v55 = vsub.f32 %v368_v21, %v5514_v61 }
 0x168   : > { %2673 = vmatmul.f32.vlgmr.msrb.gmra.mxu3 %v6038_v3  ;;  %2786 = vmatpush.msra.mxu2 %v5386_v19  ;;  %v364_v3 = vld [vmem:[%s5782_s1 + $0x348] sm:$0xff]  ;;  %v2846_v26 = vand.u32 4294901760, %v2845_v17  ;;  %v2874_v17 = vand.u32 4294901760, %v5527_v16 }
 0x169   : > { %2829 = vmatpush.msra.mxu3 %v2828_v62  ;;  %2578 = vmatpush.msrb.mxu1 %v2577_v7  ;;  %v5529_v62 = vand.u32 4294901760, %v366_v60  ;;  %v2857_v7 = vsub.f32 %v5470_v44, %v5888_v9  ;;  %v2863_v9 = vsub.f32 %v5487_v12, %v5889_v39  ;;  %v2852_v21 = vand.u32 4294901760, %v2851_v30 }
 0x16a   : > { %2580 = vmatmul.f32.vlgmr.msrb.gmra.mxu1 %v4128_v49  ;;  %2696 = vmatpush.msra.mxu0 %v2509_v8  ;;  %v6039_v8 = vand.u32 4294901760, %v5227_v20  ;;  %v360_v20 = vld [vmem:[%s5782_s1 + $0x328] sm:$0xff]  ;;  %v2880_v30 = vand.u32 4294901760, %v5543_v55 }
 0x16b   : > { %2747 = vmatpush.msra.mxu1 %v5138_v13  ;;  %2788 = vmatpush.msra.mxu2 %v5404_v36  ;;  %v5545_v13 = vand.u32 4294901760, %v364_v3  ;;  %v2858_v39 = vand.u32 4294901760, %v2857_v7  ;;  %v2864_v7 = vand.u32 4294901760, %v2863_v9 }
 0x16c   : > { %2835 = vmatpush.msra.mxu3 %v2834_v4  ;;  %2700 = vmatpush.msra.mxu0 %v6039_v8  ;;  %v6040_v4 = vand.u32 4294901760, %v5251_v1  ;;  %v5559_v8 = vsub.f32 %v366_v60, %v5529_v62  ;;  %v6041_v1 = vand.u32 4294901760, %v5267_v48  ;;  %v2869_v60 = vsub.f32 %v5512_v10, %v5890_v5 }
 0x16d   : > { %2749 = vmatpush.msra.mxu1 %v5148_v63  ;;  %2790 = vmatpush.msra.mxu2 %v5418_v37  ;;  %v5561_v63 = vand.u32 4294901760, %v362_v25  ;;  %v6042_v48 = vand.u32 4294901760, %v5272_v35  ;;  %v6043_v35 = vand.u32 4294901760, %v5297_v18  ;;  %v6044_v18 = vand.u32 4294901760, %v5312_v15 }
 0x16e   : > { %2841 = vmatpush.msra.mxu3 %v2840_v41  ;;  %2704 = vmatpush.msra.mxu0 %v6040_v4  ;;  %v358_v41 = vld [vmem:[%s5782_s1 + $0x318] sm:$0xff]  ;;  %v5575_v4 = vsub.f32 %v364_v3, %v5545_v13  ;;  %v2870_v9 = vand.u32 4294901760, %v2869_v60 }
 0x16f   : > { %2751 = vmatpush.msra.mxu1 %v5158_v40  ;;  %2792 = vmatpush.msra.mxu2 %v5434_v45  ;;  %v5577_v40 = vand.u32 4294901760, %v360_v20  ;;  %v5588_v3 = vsub.f32 %v362_v25, %v5561_v63  ;;  %v5590_v5 = vand.u32 4294901760, %v358_v41  ;;  %v2881_v25 = vsub.f32 %v5543_v55, %v2880_v30 }
 0x170   : > { %2847 = vmatpush.msra.mxu3 %v2846_v26  ;;  %2708 = vmatpush.msra.mxu0 %v6041_v1  ;;  %v2875_v26 = vsub.f32 %v5527_v16, %v2874_v17  ;;  %v2886_v1 = vand.u32 4294901760, %v5559_v8 }
 0x171   : > { %2753 = vmatpush.msra.mxu1 %v5171_v54  ;;  %2794 = vmatpush.msra.mxu2 %v5440_v59  ;;  %v356_v54 = vld [vmem:[%s5782_s1 + $0x308] sm:$0xff]  ;;  %v2882_v15 = vand.u32 4294901760, %v2881_v25 }
 0x172   : > { %2853 = vmatpush.msra.mxu3 %v2852_v21  ;;  %2712 = vmatpush.msra.mxu0 %v6042_v48  ;;  %v2892_v21 = vand.u32 4294901760, %v5575_v4  ;;  %v5604_v48 = vsub.f32 %v360_v20, %v5577_v40  ;;  %v2887_v60 = vsub.f32 %v5559_v8, %v2886_v1  ;;  %v5617_v20 = vsub.f32 %v358_v41, %v5590_v5 }
 0x173   : > { %2755 = vmatpush.msra.mxu1 %v5184_v50  ;;  %2796 = vmatpush.msra.mxu2 %v5456_v46  ;;  %v5608_v50 = vand.u32 4294901760, %v356_v54 }
 0x174   : > { %2859 = vmatpush.msra.mxu3 %v2858_v39  ;;  %2716 = vmatpush.msra.mxu0 %v6043_v35  ;;  %v2876_v39 = vand.u32 4294901760, %v2875_v26  ;;  %v2898_v35 = vand.u32 4294901760, %v5588_v3  ;;  %v2904_v26 = vand.u32 4294901760, %v5604_v48  ;;  %v2910_v25 = vand.u32 4294901760, %v5617_v20 }
 0x175   : > { %2757 = vmatpush.msra.mxu1 %v5192_v0  ;;  %2798 = vmatpush.msra.mxu2 %v5481_v27  ;;  %v6045_v0 = vand.u32 4294901760, %v5324_v42  ;;  %v5630_v41 = vsub.f32 %v356_v54, %v5608_v50  ;;  %v2888_v42 = vand.u32 4294901760, %v2887_v60 }
 0x176   : > { %2865 = vmatpush.msra.mxu3 %v2864_v7  ;;  %2720 = vmatpush.msra.mxu0 %v6044_v18  ;;  %v2893_v7 = vsub.f32 %v5575_v4, %v2892_v21 }
 0x177   : > { %2759 = vmatpush.msra.mxu1 %v5214_v57  ;;  %2800 = vmatpush.msra.mxu2 %v5497_v14  ;;  %v6046_v57 = vand.u32 4294901760, %v5337_v23  ;;  %v2905_v23 = vsub.f32 %v5604_v48, %v2904_v26  ;;  %v2916_v18 = vand.u32 4294901760, %v5630_v41 }
 0x178   : > { %2871 = vmatpush.msra.mxu3 %v2870_v9  ;;  %2724 = vmatpush.msra.mxu0 %v6045_v0  ;;  %v2899_v9 = vsub.f32 %v5588_v3, %v2898_v35  ;;  %v2894_v54 = vand.u32 4294901760, %v2893_v7 }
 0x179   : > { %2761 = vmatpush.msra.mxu1 %v5234_v52  ;;  %2802 = vmatpush.msra.mxu2 %v5514_v61  ;;  %v6047_v52 = vand.u32 4294901760, %v5355_v22  ;;  %v2911_v22 = vsub.f32 %v5617_v20, %v2910_v25  ;;  %v2906_v60 = vand.u32 4294901760, %v2905_v23 }
 0x17a   : > { %2877 = vmatpush.msra.mxu3 %v2876_v39  ;;  %2728 = vmatpush.msra.mxu0 %v6046_v57  ;;  %v2900_v39 = vand.u32 4294901760, %v2899_v9 }
 0x17b   : > { %2763 = vmatpush.msra.mxu1 %v5239_v11  ;;  %2804 = vmatpush.msra.mxu2 %v5529_v62  ;;  %v6048_v11 = vand.u32 4294901760, %v5374_v28  ;;  %v2917_v28 = vsub.f32 %v5630_v41, %v2916_v18  ;;  %v2912_v0 = vand.u32 4294901760, %v2911_v22 }
 0x17c   : > { %2883 = vmatpush.msra.mxu3 %v2882_v15  ;;  %2732 = vmatpush.msra.mxu0 %v6047_v52 }
 0x17d   : > { %2765 = vmatpush.msra.mxu1 %v5264_v24  ;;  %2806 = vmatpush.msra.mxu2 %v5545_v13  ;;  %v6049_v24 = vand.u32 4294901760, %v5393_v2 }
 0x17e   : > { %2889 = vmatpush.msra.mxu3 %v2888_v42  ;;  %2736 = vmatpush.msra.mxu0 %v6048_v11 }
 0x17f   : > { %2767 = vmatpush.msra.mxu1 %v5281_v58  ;;  %2808 = vmatpush.msra.mxu2 %v5561_v63  ;;  %v2918_v58 = vand.u32 4294901760, %v2917_v28 }
 0x180   : > { %2895 = vmatpush.msra.mxu3 %v2894_v54  ;;  %2740 = vmatpush.msra.mxu0 %v6049_v24 }
 0x181   : > { %2769 = vmatpush.msra.mxu1 %v5293_v29  ;;  %2810 = vmatpush.msra.mxu2 %v5577_v40  ;;  %v6050_v29 = vand.u32 4294901760, %v5396_v51 }
 0x182   : > { %2901 = vmatpush.msra.mxu3 %v2900_v39  ;;  %2742 = vmatmul.f32.vlgmr.msra.gmra.mxu0 %v4128_v49 }
 0x183   : > { %2927 = vmatpush.msrb.mxu0 %v5396_v51  ;;  %2771 = vmatpush.msra.mxu1 %v5309_v6  ;;  %v6051_v6 = vld [vmem:[#allocation11_spill] sm:$0xff] }
 0x184   : > { %2812 = vmatpush.msra.mxu2 %v5590_v5  ;;  %2907 = vmatpush.msra.mxu3 %v2906_v60 }
 0x185   : > { %2930 = vmatpush.msrb.mxu0 %v5416_v33  ;;  %2773 = vmatpush.msra.mxu1 %v5320_v34  ;;  %v6052_v34 = vand.u32 4294901760, %v5416_v33 }
 0x186   : > { %2814 = vmatpush.msra.mxu2 %v5608_v50  ;;  %2913 = vmatpush.msra.mxu3 %v2912_v0 }
 0x187   : > { %2820 = vmatmul.f32.vlgmr.msra.gmra.mxu2 %v4487_v43  ;;  %2933 = vmatpush.msrb.mxu0 %v5432_v38  ;;  %v6053_v43 = vand.u32 4294901760, %v5432_v38  ;;  %v6056_v38 = vand.u32 4294901760, %v5470_v44 }
 0x188   : > { %3021 = vmatpush.msrb.mxu2 %v6050_v29  ;;  %2775 = vmatpush.msra.mxu1 %v5341_v32  ;;  %v6054_v32 = vand.u32 4294901760, %v5446_v47 }
 0x189   : > { %2919 = vmatpush.msra.mxu3 %v2918_v58  ;;  %2936 = vmatpush.msrb.mxu0 %v5446_v47 }
 0x18a   : > { %2921 = vmatmul.f32.vlgmr.msra.gmra.mxu3 %v6051_v6  ;;  %3025 = vmatpush.msrb.mxu2 %v6052_v34 }
 0x18b   : > { %3088 = vmatpush.msrb.mxu3 %v5366_v56  ;;  %2777 = vmatpush.msra.mxu1 %v5363_v31  ;;  %v6057_v31 = vand.u32 4294901760, %v5487_v12 }
 0x18c   : > { %2779 = vmatmul.f32.vlgmr.msra.gmra.mxu1 %v4128_v49  ;;  %2939 = vmatpush.msrb.mxu0 %v5465_v53  ;;  %v6055_v49 = vand.u32 4294901760, %v5465_v53 }
 0x18d   : > { %2980 = vmatpush.msrb.mxu1 %v5366_v56  ;;  %3029 = vmatpush.msrb.mxu2 %v6053_v43  ;;  %v589_v56 = vpop.f32.mrf.mxu2 }
 0x18e   : > { %3090 = vmatpush.msrb.mxu3 %v5386_v19  ;;  %2942 = vmatpush.msrb.mxu0 %v5470_v44 }
 0x18f   : > { %2982 = vmatpush.msrb.mxu1 %v5386_v19  ;;  %3033 = vmatpush.msrb.mxu2 %v6054_v32  ;;  %v628_v19 = vpop.f32.mrf.mxu3 }
 0x190   : > { %3092 = vmatpush.msrb.mxu3 %v5404_v36  ;;  %2945 = vmatpush.msrb.mxu0 %v5487_v12  ;;  %v434_v12 = vpop.f32.mrf.mxu0 }
 0x191   : > { %2984 = vmatpush.msrb.mxu1 %v5404_v36  ;;  %3037 = vmatpush.msrb.mxu2 %v6055_v49 }
 0x192   : > { %3094 = vmatpush.msrb.mxu3 %v5418_v37  ;;  %2948 = vmatpush.msrb.mxu0 %v5512_v10 }
 0x193   : > { %2986 = vmatpush.msrb.mxu1 %v5418_v37  ;;  %3041 = vmatpush.msrb.mxu2 %v6056_v38  ;;  %v6058_v37 = vand.u32 4294901760, %v5512_v10 }
 0x194   : > { %3096 = vmatpush.msrb.mxu3 %v5434_v45  ;;  %2951 = vmatpush.msrb.mxu0 %v5527_v16 }
 0x195   : > { %2988 = vmatpush.msrb.mxu1 %v5434_v45  ;;  %3045 = vmatpush.msrb.mxu2 %v6057_v31  ;;  %v535_v45 = vpop.f32.mrf.mxu1  ;;  %v775_v36 = vpop.f32.mrf.mxu2 }
 0x196   : > { %3098 = vmatpush.msrb.mxu3 %v5440_v59  ;;  %2954 = vmatpush.msrb.mxu0 %v5543_v55 }
 0x197   : > { %2990 = vmatpush.msrb.mxu1 %v5440_v59  ;;  %3049 = vmatpush.msrb.mxu2 %v6058_v37  ;;  %v6060_v59 = vld [vmem:[#allocation18_spill] sm:$0xff]  ;;  %v876_v33 = vpop.f32.mrf.mxu3 }
 0x198   : > { %3100 = vmatpush.msrb.mxu3 %v5456_v46  ;;  %2957 = vmatpush.msrb.mxu0 %v5559_v8  ;;  %v697_v51 = vpop.f32.mrf.mxu0 }
 0x199   : > { %2992 = vmatpush.msrb.mxu1 %v5456_v46  ;;  %3053 = vmatpush.msrb.mxu2 %v2874_v17  ;;  %v6059_v46 = vld [vmem:[#allocation12_spill] sm:$0xff] }
 0x19a   : > { %3102 = vmatpush.msrb.mxu3 %v5481_v27  ;;  %2960 = vmatpush.msrb.mxu0 %v5575_v4 }
 0x19b   : > { %2994 = vmatpush.msrb.mxu1 %v5481_v27  ;;  %3057 = vmatpush.msrb.mxu2 %v2880_v30 }
 0x19c   : > { %3104 = vmatpush.msrb.mxu3 %v5497_v14  ;;  %2963 = vmatpush.msrb.mxu0 %v5588_v3 }
 0x19d   : > { %2996 = vmatpush.msrb.mxu1 %v5497_v14  ;;  %3061 = vmatpush.msrb.mxu2 %v2886_v1  ;;  %v734_v2 = vpop.f32.mrf.mxu1  ;;  %v1038_v53 = vpop.f32.mrf.mxu2 }
 0x19e   : > { %3106 = vmatpush.msrb.mxu3 %v5514_v61  ;;  %2966 = vmatpush.msrb.mxu0 %v5604_v48 }
 0x19f   : > { %2998 = vmatpush.msrb.mxu1 %v5514_v61  ;;  %3065 = vmatpush.msrb.mxu2 %v2892_v21  ;;  %v1075_v44 = vpop.f32.mrf.mxu3 }
 0x1a0   : > { %3108 = vmatpush.msrb.mxu3 %v5529_v62  ;;  %2969 = vmatpush.msrb.mxu0 %v5617_v20  ;;  %v930_v10 = vpop.f32.mrf.mxu0 }
 0x1a1   : > { %3000 = vmatpush.msrb.mxu1 %v5529_v62  ;;  %3069 = vmatpush.msrb.mxu2 %v2898_v35 }
 0x1a2   : > { %3110 = vmatpush.msrb.mxu3 %v5545_v13  ;;  %2972 = vmatpush.msrb.mxu0 %v5630_v41 }
 0x1a3   : > { %3002 = vmatpush.msrb.mxu1 %v5545_v13  ;;  %3073 = vmatpush.msrb.mxu2 %v2904_v26 }
 0x1a4   : > { %3112 = vmatpush.msrb.mxu3 %v5561_v63  ;;  %2975 = vmatmul.f32.vlgmr.msrb.gmra.mxu0 %v6059_v46 }
 0x1a5   : > { %3004 = vmatpush.msrb.mxu1 %v5561_v63  ;;  %3077 = vmatpush.msrb.mxu2 %v2910_v25  ;;  %v969_v47 = vpop.f32.mrf.mxu1  ;;  %v1271_v55 = vpop.f32.mrf.mxu2 }
 0x1a6   : > { %3114 = vmatpush.msrb.mxu3 %v5577_v40 }
 0x1a7   : > { %3006 = vmatpush.msrb.mxu1 %v5577_v40  ;;  %3081 = vmatpush.msrb.mxu2 %v2916_v18  ;;  %v1310_v14 = vpop.f32.mrf.mxu3  ;;  %v536_v40 = vadd.f32 %v535_v45, %v434_v12 }
 0x1a8   : > { %3116 = vmatpush.msrb.mxu3 %v5590_v5  ;;  %3083 = vmatmul.f32.vlgmr.msrb.gmra.mxu2 %v6051_v6  ;;  %v1116_v27 = vpop.f32.mrf.mxu0 }
 0x1a9   : > { %3008 = vmatpush.msrb.mxu1 %v5590_v5  ;;  %v590_v48 = vadd.f32 %v589_v56, %v536_v40 }
 0x1aa   : > { %3118 = vmatpush.msrb.mxu3 %v5608_v50 }
 0x1ab   : > { %3120 = vmatmul.f32.vlgmr.msrb.gmra.mxu3 %v6051_v6  ;;  %3010 = vmatpush.msrb.mxu1 %v5608_v50  ;;  %v629_v20 = vadd.f32 %v628_v19, %v590_v48 }
 0x1ac   : > { %3014 = vmatmul.f32.vlgmr.msrb.gmra.mxu1 %v6060_v59 }
 0x1ad   : > { %v1217_v16 = vpop.f32.mrf.mxu1  ;;  %v1457_v5 = vpop.f32.mrf.mxu2  ;;  %v698_v26 = vadd.f32 %v697_v51, %v629_v20 }
 0x1af   : > { %v1558_v13 = vpop.f32.mrf.mxu3  ;;  %v735_v42 = vadd.f32 %v734_v2, %v698_v26 }
 0x1b0   : > { %v1379_v62 = vpop.f32.mrf.mxu0 }
 0x1b1   : > { %v776_v52 = vadd.f32 %v775_v36, %v735_v42 }
 0x1b3   : > { %v877_v18 = vadd.f32 %v876_v33, %v776_v52 }
 0x1b5   : > { %v1416_v61 = vpop.f32.mrf.mxu1  ;;  %v5758_v63 = vpop.f32.mrf.mxu2  ;;  %v931_v22 = vadd.f32 %v930_v10, %v877_v18 }
 0x1b7   : > { %v5760_v30 = vpop.f32.mrf.mxu3  ;;  %v970_v28 = vadd.f32 %v969_v47, %v931_v22 }
 0x1b8   : > { %v1612_v8 = vpop.f32.mrf.mxu0 }
 0x1b9   : > { %v1039_v29 = vadd.f32 %v1038_v53, %v970_v28 }
 0x1bb   : > { %v1076_v43 = vadd.f32 %v1075_v44, %v1039_v29 }
 0x1bd   : > { %v5756_v17 = vpop.f32.mrf.mxu1  ;;  %v1953_v21 = vpop.f32.mrf.mxu2  ;;  %v1117_v38 = vadd.f32 %v1116_v27, %v1076_v43 }
 0x1bf   : > { %v1992_v35 = vpop.f32.mrf.mxu3  ;;  %v1218_v46 = vadd.f32 %v1217_v16, %v1117_v38 }
 0x1c0   : > { %v1798_v1 = vpop.f32.mrf.mxu0 }
 0x1c1   : > { %v1272_v12 = vadd.f32 %v1271_v55, %v1218_v46 }
 0x1c3   : > { %v1311_v2 = vadd.f32 %v1310_v14, %v1272_v12 }
 0x1c5   : > { %v1899_v4 = vpop.f32.mrf.mxu1  ;;  %v2139_v25 = vpop.f32.mrf.mxu2  ;;  %v1380_v33 = vadd.f32 %v1379_v62, %v1311_v2 }
 0x1c6   : > { %v1900_v3 = vadd.f32 %v1899_v4, %v1798_v1 }
 0x1c7   : > { %v2240_v23 = vpop.f32.mrf.mxu3  ;;  %v1417_v53 = vadd.f32 %v1416_v61, %v1380_v33 }
 0x1c8   : > { %v1954_v50 = vadd.f32 %v1953_v21, %v1900_v3  ;;  %v2061_v7 = vpop.f32.mrf.mxu0 }
 0x1c9   : > { %v1458_v40 = vadd.f32 %v1457_v5, %v1417_v53 }
 0x1ca   : > { %v1993_v15 = vadd.f32 %v1992_v35, %v1954_v50 }
 0x1cb   : > { %v1559_v3 = vadd.f32 %v1558_v13, %v1458_v40 }
 0x1cc   : > { %v2062_v41 = vadd.f32 %v2061_v7, %v1993_v15 }
 0x1cd   : > { %v2098_v57 = vpop.f32.mrf.mxu1  ;;  %v2402_v58 = vpop.f32.mrf.mxu2  ;;  %v1613_v48 = vadd.f32 %v1612_v8, %v1559_v3 }
 0x1ce   : > { %v2099_v9 = vadd.f32 %v2098_v57, %v2062_v41 }
 0x1cf   : > { %v2439_v34 = vpop.f32.mrf.mxu3  ;;  %v1652_v50 = vadd.f32 %v5756_v17, %v1613_v48 }
 0x1d0   : > { %v2140_v54 = vadd.f32 %v2139_v25, %v2099_v9  ;;  %v2294_v11 = vpop.f32.mrf.mxu0 }
 0x1d1   : > { %v1721_v15 = vadd.f32 %v5758_v63, %v1652_v50 }
 0x1d2   : > { %v2241_v39 = vadd.f32 %v2240_v23, %v2140_v54 }
 0x1d3   : > { %v1758_v5 = vadd.f32 %v5760_v30, %v1721_v15 }
 0x1d4   : > { %v2295_v60 = vadd.f32 %v2294_v11, %v2241_v39 }
 0x1d5   : > { %v2333_v24 = vpop.f32.mrf.mxu1 }
 0x1d6   : > { %v2334_v0 = vadd.f32 %v2333_v24, %v2295_v60 }
 0x1d8   : > { %v2403_v6 = vadd.f32 %v2402_v58, %v2334_v0 }
 0x1da   : > { %v2440_v49 = vadd.f32 %v2439_v34, %v2403_v6 }
 0x1dd   : > { %v2480_v32 = vpop.f32.mrf.mxu0 }
 0x1de   : > { %v2481_v37 = vadd.f32 %v2480_v32, %v2440_v49 }
 0x1e7   : > { %v2581_v31 = vpop.f32.mrf.mxu1 }
 0x1e8   : > { %v2582_v59 = vadd.f32 %v2581_v31, %v2481_v37  ;;  %v2635_v45 = vpop.f32.mrf.mxu2 }
 0x1ea   : > { %v2636_v56 = vadd.f32 %v2635_v45, %v2582_v59 }
 0x1eb   : > { %v2674_v19 = vpop.f32.mrf.mxu3 }
 0x1ec   : > { %v2675_v36 = vadd.f32 %v2674_v19, %v2636_v56 }
 0x1ff   : > { %v2743_v51 = vpop.f32.mrf.mxu0 }
 0x200   : > { %v2744_v10 = vadd.f32 %v2743_v51, %v2675_v36 }
 0x209   : > { %v2780_v47 = vpop.f32.mrf.mxu1 }
 0x20a   : > { %v2781_v4 = vadd.f32 %v2780_v47, %v2744_v10  ;;  %v2821_v44 = vpop.f32.mrf.mxu2 }
 0x20c   : > { %v2822_v27 = vadd.f32 %v2821_v44, %v2781_v4 }
 0x20d   : > { %v2922_v1 = vpop.f32.mrf.mxu3 }
 0x20e   : > { %v2923_v21 = vadd.f32 %v2922_v1, %v2822_v27 }
 0x221   : > { %v2976_v16 = vpop.f32.mrf.mxu0 }
 0x222   : > { %v2977_v55 = vadd.f32 %v2976_v16, %v2923_v21 }
 0x229   : > { %v3015_v14 = vpop.f32.mrf.mxu1 }
 0x22a   : > { %v3016_v35 = vadd.f32 %v3015_v14, %v2977_v55 }
 0x22b   : > { %v3084_v20 = vpop.f32.mrf.mxu2 }
 0x22c   : > { %v3085_v62 = vadd.f32 %v3084_v20, %v3016_v35 }
 0x22e   : > { %v3121_v61 = vpop.f32.mrf.mxu3 }
 0x22f   : > { %v3122_v7 = vadd.f32 %v3121_v61, %v3085_v62 }
 0x231   : > { %v3126_v13 = vrot.slane %v3122_v7, 7 }
 0x233   : > { %v3128_v8 = vsel %vm216_vm1, %v1758_v5, %v3126_v13 }
 0x234   : > { %3134 = vst.msk [vmem:[%s167_s8] sm:$0x3] %vm3766_vm2, %v3128_v8 }
 0x235 PF: > { %s12_s11 = sadd.s32 1, %s3262_s11   ;;  %s6062_s9 = smov %s3258_s10 }
 0x236   : > { %p9_p5 = scmp.ge.s32.totalorder %s12_s11, 4   ;;  %s6063_s10 = smov %s6065_s12 }
 0x238   :  { %11 = sbr.rel (!%p9_p5) target bundleno = 2 (0x2), region = 70 }

</bundles_post_ra>
